<compile_context>
chip_gen: v7x
topology: tpu7x:2x2x1
jax: 0.10.0
libtpu: 0.0.40
codegen_flags: <defaults>
</compile_context>

<pallas_src>
import functools

import jax
import jax.numpy as jnp
from jax import lax
from jax.experimental import pallas as pl
from jax.experimental.pallas import tpu as pltpu


# ---------------------- fused RRCNN forward kernel (per image) ----------------

def _rrcnn_fused_kernel(x_ref, w1t_ref, b1_ref, w9a_ref, sha_ref, w9b_ref,
                        shb_ref, o_ref, xpf_ref, col_ref, *, H, W, C, t, xpad):
    """One grid step = one image.  Channel-major flat layout (C, H*W)."""
    P = H * W

    # Zero the shift-pad scratch once per grid step (convs only rewrite the
    # interior; the pad lanes must read back as zero for the SAME padding).
    xpf_ref[...] = jnp.zeros_like(xpf_ref)

    # Static per-lane column masks (lane p = y*W + x) for the horizontal taps.
    lane = lax.broadcasted_iota(jnp.int32, (C, P), 1)
    xcol = lane % W
    not_left = xcol != 0            # valid lanes when reading x-1
    not_right = xcol != (W - 1)     # valid lanes when reading x+1

    def conv3_bn_relu(xin, w9, shift):
        # xin: (C, P) f32. 'SAME' 3x3 conv + folded BN/bias + ReLU, one matmul.
        xpf_ref[:, xpad:xpad + P] = xin              # lane-aligned full store
        for k in range(9):
            dy, dx = divmod(k, 3)
            off = xpad + (dy - 1) * W + (dx - 1)     # static lane offset
            v = xpf_ref[:, off:off + P]              # shifted-window read
            if dx == 0:
                v = jnp.where(not_left, v, 0.0)      # mask row-wrap at x==0
            elif dx == 2:
                v = jnp.where(not_right, v, 0.0)     # mask row-wrap at x==W-1
            col_ref[k * C:(k + 1) * C, :] = v        # sublane-aligned slab
        acc = jnp.dot(w9, col_ref[...], preferred_element_type=jnp.float32)
        return jnp.maximum(acc + shift, 0.0)         # BN scale already in w9

    def recurrent_block(xin, w9, shift):
        # Matches PyTorch Recurrent_block.forward: x1 = conv(x); t x conv(x+x1)
        x1 = conv3_bn_relu(xin, w9, shift)
        for _ in range(t):
            x1 = conv3_bn_relu(xin + x1, w9, shift)
        return x1

    # 1x1 conv: the NCHW per-batch block is already (Cin, H*W) -- no transpose.
    x0 = jnp.dot(w1t_ref[...], x_ref[0],
                 preferred_element_type=jnp.float32) + b1_ref[...]

    y = recurrent_block(x0, w9a_ref[...], sha_ref[...])
    z = recurrent_block(y, w9b_ref[...], shb_ref[...])
    o_ref[0] = (x0 + z).astype(o_ref.dtype)          # fused final skip add


def rrcnn_block_forward(x_nchw, params, t=2):
    N, Cin, H, W = x_nchw.shape
    Cout = params["w1x1"].shape[1]
    P = H * W
    xpad = 128                        # lane-aligned interior start of pad buf
    assert xpad >= W + 1              # must cover the largest tap back-shift

    def fold(rec):
        # Fold the BN scale into the conv weights; shift already holds
        # conv-bias / running-mean / beta (see init_params).
        w, scale, shift = rec         # w: (3,3,Cout,Cout) HWIO
        w9 = (w * scale[None, None, None, :]).reshape(9 * Cout, Cout).T
        return w9, shift.reshape(Cout, 1)            # (Cout, 9*Cout), (Cout,1)

    w9a, sha = fold(params["rec1"])
    w9b, shb = fold(params["rec2"])
    w1t = params["w1x1"].T                           # (Cout, Cin)
    b1 = params["b1x1"].reshape(Cout, 1)
    xin = x_nchw.reshape(N, Cin, P)                  # contiguous view, free

    kernel = functools.partial(_rrcnn_fused_kernel, H=H, W=W, C=Cout, t=t,
                               xpad=xpad)
    out = pl.pallas_call(
        kernel,
        out_shape=jax.ShapeDtypeStruct((N, Cout, P), x_nchw.dtype),
        grid_spec=pltpu.PrefetchScalarGridSpec(
            num_scalar_prefetch=0,
            grid=(N,),
            in_specs=[
                pl.BlockSpec((1, Cin, P), lambda n: (n, 0, 0)),     # image
                pl.BlockSpec((Cout, Cin), lambda n: (0, 0)),        # w1x1.T
                pl.BlockSpec((Cout, 1), lambda n: (0, 0)),          # b1x1
                pl.BlockSpec((Cout, 9 * Cout), lambda n: (0, 0)),   # rec1 w
                pl.BlockSpec((Cout, 1), lambda n: (0, 0)),          # rec1 sh
                pl.BlockSpec((Cout, 9 * Cout), lambda n: (0, 0)),   # rec2 w
                pl.BlockSpec((Cout, 1), lambda n: (0, 0)),          # rec2 sh
            ],
            out_specs=pl.BlockSpec((1, Cout, P), lambda n: (n, 0, 0)),
            scratch_shapes=[
                pltpu.VMEM((Cout, xpad + P + xpad), jnp.float32),   # shift pad
                pltpu.VMEM((9 * Cout, P), jnp.float32),             # im2col
            ]),
        compiler_params=pltpu.CompilerParams(
            dimension_semantics=("parallel",)),
    )(xin, w1t, b1, w9a, sha, w9b, shb)
    return out.reshape(N, Cout, H, W)                # already NCHW


# ------------------------------- pure-JAX ref ----------------------------------

def _ref_conv_br(x, w, scale, shift):
    y = lax.conv_general_dilated(x, w, (1, 1), "SAME",
                                 dimension_numbers=("NHWC", "HWIO", "NHWC"))
    return jnp.maximum(y * scale + shift, 0.0)


def _ref_rec(x, block_params, t=2):
    w, scale, shift = block_params
    x1 = _ref_conv_br(x, w, scale, shift)
    for _ in range(t):
        x1 = _ref_conv_br(x + x1, w, scale, shift)
    return x1


def rrcnn_block_ref(x_nchw, params, t=2):
    x = jnp.transpose(x_nchw, (0, 2, 3, 1))
    Cin, Cout = params["w1x1"].shape
    x0 = lax.conv_general_dilated(
        x, params["w1x1"].reshape(1, 1, Cin, Cout), (1, 1), "VALID",
        dimension_numbers=("NHWC", "HWIO", "NHWC")) + params["b1x1"]
    y = _ref_rec(x0, params["rec1"], t=t)
    y = _ref_rec(y, params["rec2"], t=t)
    return jnp.transpose(x0 + y, (0, 3, 1, 2))


# ---------------------------------- params --------------------------------------

def init_params(key, ch_in, ch_out, eps=1e-5):
    ks = jax.random.split(key, 14)

    def rec_params(k0, k1, k2, k3, k4, k5):
        w = 0.1 * jax.random.normal(k0, (3, 3, ch_out, ch_out), jnp.float32)
        b = 0.1 * jax.random.normal(k1, (ch_out,), jnp.float32)
        gamma = 1.0 + 0.1 * jax.random.normal(k2, (ch_out,), jnp.float32)
        beta = 0.1 * jax.random.normal(k3, (ch_out,), jnp.float32)
        mean = 0.1 * jax.random.normal(k4, (ch_out,), jnp.float32)
        var = 0.5 + jax.random.uniform(k5, (ch_out,), jnp.float32)
        scale = gamma / jnp.sqrt(var + eps)
        shift = (b - mean) * scale + beta          # conv bias folded into BN
        return (w, scale, shift)

    return {
        "w1x1": 0.1 * jax.random.normal(ks[0], (ch_in, ch_out), jnp.float32),
        "b1x1": 0.1 * jax.random.normal(ks[1], (ch_out,), jnp.float32),
        "rec1": rec_params(*ks[2:8]),
        "rec2": rec_params(*ks[8:14]),
    }


# ----------------------------------- main ----------------------------------------

if __name__ == "__main__":
    key = jax.random.PRNGKey(0)
    kx, kp = jax.random.split(key)

    N, ch_in, ch_out, H, W = 2, 4, 8, 16, 16
    x = jax.random.normal(kx, (N, ch_in, H, W), jnp.float32)   # NCHW like PyTorch
    params = init_params(kp, ch_in, ch_out)

    fwd = jax.jit(functools.partial(rrcnn_block_forward, t=2))
    out = jax.block_until_ready(fwd(x, params))
    ref = jax.block_until_ready(rrcnn_block_ref(x, params, t=2))

    assert out.shape == (N, ch_out, H, W)
    err = float(jnp.max(jnp.abs(out - ref)))
    assert jnp.allclose(out, ref, atol=1e-3, rtol=1e-3), f"max abs err {err}"
    print("KERNEL_OK")
</pallas_src>

<mosaic_0001>
module attributes {stable_mosaic.version = 11 : i64} {
  func.func @_rrcnn_fused_kernel(%arg0: i32, %arg1: memref<1x4x256xf32, #tpu.memory_space<vmem>>, %arg2: memref<8x4xf32, #tpu.memory_space<vmem>>, %arg3: memref<8x1xf32, #tpu.memory_space<vmem>>, %arg4: memref<8x72xf32, #tpu.memory_space<vmem>>, %arg5: memref<8x1xf32, #tpu.memory_space<vmem>>, %arg6: memref<8x72xf32, #tpu.memory_space<vmem>>, %arg7: memref<8x1xf32, #tpu.memory_space<vmem>>, %arg8: memref<1x8x256xf32, #tpu.memory_space<vmem>>, %arg9: memref<8x512xf32, #tpu.memory_space<vmem>>, %arg10: memref<72x256xf32, #tpu.memory_space<vmem>>) attributes {dimension_semantics = [#tpu.dimension_semantics<parallel>], iteration_bounds = array<i64: 2>, scalar_prefetch = 0 : i64, scratch_operands = 2 : i64, tpu.core_type = #tpu.core_type<tc>, window_params = [{transform_indices = @transform_0, window_bounds = array<i64: 1, 4, 256>}, {pipeline_mode = #tpu.pipeline_mode<synchronous>, transform_indices = @transform_1, window_bounds = array<i64: 8, 4>}, {pipeline_mode = #tpu.pipeline_mode<synchronous>, transform_indices = @transform_2, window_bounds = array<i64: 8, 1>}, {pipeline_mode = #tpu.pipeline_mode<synchronous>, transform_indices = @transform_3, window_bounds = array<i64: 8, 72>}, {pipeline_mode = #tpu.pipeline_mode<synchronous>, transform_indices = @transform_4, window_bounds = array<i64: 8, 1>}, {pipeline_mode = #tpu.pipeline_mode<synchronous>, transform_indices = @transform_5, window_bounds = array<i64: 8, 72>}, {pipeline_mode = #tpu.pipeline_mode<synchronous>, transform_indices = @transform_6, window_bounds = array<i64: 8, 1>}, {transform_indices = @transform_7, window_bounds = array<i64: 1, 8, 256>}]} {
    %cst = arith.constant 0.000000e+00 : f32
    %0 = vector.broadcast %cst : f32 to vector<8x512xf32>
    %c0 = arith.constant 0 : index
    %c0_0 = arith.constant 0 : index
    %1 = vector.load %arg9[%c0, %c0_0] : memref<8x512xf32, #tpu.memory_space<vmem>>, vector<8x512xf32>
    tpu.vector_store %arg9[%c0, %c0_0], %0 {strides = array<i32>} : memref<8x512xf32, #tpu.memory_space<vmem>>, vector<8x512xf32>,
    %2 = tpu.iota {dimensions = array<i32: 1>} : vector<8x256xi32>
    %c16_i32 = arith.constant 16 : i32
    %c0_i32 = arith.constant 0 : i32
    %3 = arith.cmpi eq, %c16_i32, %c0_i32 : i32
    %c1_i32 = arith.constant 1 : i32
    %4 = arith.select %3, %c1_i32, %c16_i32 : i32
    %5 = vector.broadcast %4 : i32 to vector<8x256xi32>
    %6 = arith.remsi %2, %5 : vector<8x256xi32>
    %c0_i32_1 = arith.constant 0 : i32
    %7 = vector.broadcast %c0_i32_1 : i32 to vector<8x256xi32>
    %8 = arith.cmpi ne, %6, %7 : vector<8x256xi32>
    %c0_i32_2 = arith.constant 0 : i32
    %9 = vector.broadcast %c0_i32_2 : i32 to vector<8x256xi32>
    %10 = arith.cmpi slt, %6, %9 : vector<8x256xi32>
    %c0_i32_3 = arith.constant 0 : i32
    %11 = arith.cmpi slt, %4, %c0_i32_3 : i32
    %12 = vector.broadcast %11 : i1 to vector<8x256xi1>
    %13 = vector.broadcast %12 : vector<8x256xi1> to vector<8x256xi1>
    %14 = arith.xori %10, %13 : vector<8x256xi1>
    %15 = arith.andi %14, %8 : vector<8x256xi1>
    %16 = vector.broadcast %4 : i32 to vector<8x256xi32>
    %17 = arith.addi %6, %16 : vector<8x256xi32>
    %18 = arith.select %15, %17, %6 : vector<8x256xi1>, vector<8x256xi32>
    %c0_i32_4 = arith.constant 0 : i32
    %19 = vector.broadcast %c0_i32_4 : i32 to vector<8x256xi32>
    %20 = arith.cmpi ne, %18, %19 : vector<8x256xi32>
    %c15_i32 = arith.constant 15 : i32
    %21 = vector.broadcast %c15_i32 : i32 to vector<8x256xi32>
    %22 = arith.cmpi ne, %18, %21 : vector<8x256xi32>
    %c0_5 = arith.constant 0 : index
    %c0_6 = arith.constant 0 : index
    %23 = vector.load %arg2[%c0_5, %c0_6] : memref<8x4xf32, #tpu.memory_space<vmem>>, vector<8x4xf32>
    %c0_7 = arith.constant 0 : index
    %c0_8 = arith.constant 0 : index
    %c0_9 = arith.constant 0 : index
    %24 = vector.load %arg1[%c0_7, %c0_8, %c0_9] : memref<1x4x256xf32, #tpu.memory_space<vmem>>, vector<1x4x256xf32>
    %25 = vector.shape_cast %24 : vector<1x4x256xf32> to vector<4x256xf32>
    %cst_10 = arith.constant dense<0.000000e+00> : vector<8x256xf32>
    %26 = tpu.matmul %23, %25, %cst_10 {dimension_numbers = #tpu.dot_dimension_numbers<[1], [0], [0], [1], [0, 0, 1, 1], [], []>} : vector<8x4xf32>, vector<4x256xf32>, vector<8x256xf32> -> vector<8x256xf32>
    %c0_11 = arith.constant 0 : index
    %c0_12 = arith.constant 0 : index
    %27 = vector.load %arg3[%c0_11, %c0_12] : memref<8x1xf32, #tpu.memory_space<vmem>>, vector<8x1xf32>
    %28 = vector.broadcast %27 : vector<8x1xf32> to vector<8x256xf32>
    %29 = arith.addf %26, %28 : vector<8x256xf32>
    %c0_13 = arith.constant 0 : index
    %c0_14 = arith.constant 0 : index
    %30 = vector.load %arg4[%c0_13, %c0_14] : memref<8x72xf32, #tpu.memory_space<vmem>>, vector<8x72xf32>
    %c0_15 = arith.constant 0 : index
    %c0_16 = arith.constant 0 : index
    %31 = vector.load %arg5[%c0_15, %c0_16] : memref<8x1xf32, #tpu.memory_space<vmem>>, vector<8x1xf32>
    %c0_17 = arith.constant 0 : index
    %c128 = arith.constant 128 : index
    %32 = vector.load %arg9[%c0_17, %c128] : memref<8x512xf32, #tpu.memory_space<vmem>>, vector<8x256xf32>
    tpu.vector_store %arg9[%c0_17, %c128], %29 {strides = array<i32>} : memref<8x512xf32, #tpu.memory_space<vmem>>, vector<8x256xf32>,
    %c0_18 = arith.constant 0 : index
    %c111 = arith.constant 111 : index
    %33 = vector.load %arg9[%c0_18, %c111] : memref<8x512xf32, #tpu.memory_space<vmem>>, vector<8x256xf32>
    %cst_19 = arith.constant 0.000000e+00 : f32
    %34 = vector.broadcast %cst_19 : f32 to vector<8x256xf32>
    %35 = arith.select %20, %33, %34 : vector<8x256xi1>, vector<8x256xf32>
    %c0_20 = arith.constant 0 : index
    %c0_21 = arith.constant 0 : index
    %36 = vector.load %arg10[%c0_20, %c0_21] : memref<72x256xf32, #tpu.memory_space<vmem>>, vector<8x256xf32>
    tpu.vector_store %arg10[%c0_20, %c0_21], %35 {strides = array<i32>} : memref<72x256xf32, #tpu.memory_space<vmem>>, vector<8x256xf32>,
    %c0_22 = arith.constant 0 : index
    %c112 = arith.constant 112 : index
    %37 = vector.load %arg9[%c0_22, %c112] : memref<8x512xf32, #tpu.memory_space<vmem>>, vector<8x256xf32>
    %c8 = arith.constant 8 : index
    %c0_23 = arith.constant 0 : index
    %38 = vector.load %arg10[%c8, %c0_23] : memref<72x256xf32, #tpu.memory_space<vmem>>, vector<8x256xf32>
    tpu.vector_store %arg10[%c8, %c0_23], %37 {strides = array<i32>} : memref<72x256xf32, #tpu.memory_space<vmem>>, vector<8x256xf32>,
    %c0_24 = arith.constant 0 : index
    %c113 = arith.constant 113 : index
    %39 = vector.load %arg9[%c0_24, %c113] : memref<8x512xf32, #tpu.memory_space<vmem>>, vector<8x256xf32>
    %cst_25 = arith.constant 0.000000e+00 : f32
    %40 = vector.broadcast %cst_25 : f32 to vector<8x256xf32>
    %41 = arith.select %22, %39, %40 : vector<8x256xi1>, vector<8x256xf32>
    %c16 = arith.constant 16 : index
    %c0_26 = arith.constant 0 : index
    %42 = vector.load %arg10[%c16, %c0_26] : memref<72x256xf32, #tpu.memory_space<vmem>>, vector<8x256xf32>
    tpu.vector_store %arg10[%c16, %c0_26], %41 {strides = array<i32>} : memref<72x256xf32, #tpu.memory_space<vmem>>, vector<8x256xf32>,
    %c0_27 = arith.constant 0 : index
    %c127 = arith.constant 127 : index
    %43 = vector.load %arg9[%c0_27, %c127] : memref<8x512xf32, #tpu.memory_space<vmem>>, vector<8x256xf32>
    %cst_28 = arith.constant 0.000000e+00 : f32
    %44 = vector.broadcast %cst_28 : f32 to vector<8x256xf32>
    %45 = arith.select %20, %43, %44 : vector<8x256xi1>, vector<8x256xf32>
    %c24 = arith.constant 24 : index
    %c0_29 = arith.constant 0 : index
    %46 = vector.load %arg10[%c24, %c0_29] : memref<72x256xf32, #tpu.memory_space<vmem>>, vector<8x256xf32>
    tpu.vector_store %arg10[%c24, %c0_29], %45 {strides = array<i32>} : memref<72x256xf32, #tpu.memory_space<vmem>>, vector<8x256xf32>,
    %c0_30 = arith.constant 0 : index
    %c128_31 = arith.constant 128 : index
    %47 = vector.load %arg9[%c0_30, %c128_31] : memref<8x512xf32, #tpu.memory_space<vmem>>, vector<8x256xf32>
    %c32 = arith.constant 32 : index
    %c0_32 = arith.constant 0 : index
    %48 = vector.load %arg10[%c32, %c0_32] : memref<72x256xf32, #tpu.memory_space<vmem>>, vector<8x256xf32>
    tpu.vector_store %arg10[%c32, %c0_32], %47 {strides = array<i32>} : memref<72x256xf32, #tpu.memory_space<vmem>>, vector<8x256xf32>,
    %c0_33 = arith.constant 0 : index
    %c129 = arith.constant 129 : index
    %49 = vector.load %arg9[%c0_33, %c129] : memref<8x512xf32, #tpu.memory_space<vmem>>, vector<8x256xf32>
    %cst_34 = arith.constant 0.000000e+00 : f32
    %50 = vector.broadcast %cst_34 : f32 to vector<8x256xf32>
    %51 = arith.select %22, %49, %50 : vector<8x256xi1>, vector<8x256xf32>
    %c40 = arith.constant 40 : index
    %c0_35 = arith.constant 0 : index
    %52 = vector.load %arg10[%c40, %c0_35] : memref<72x256xf32, #tpu.memory_space<vmem>>, vector<8x256xf32>
    tpu.vector_store %arg10[%c40, %c0_35], %51 {strides = array<i32>} : memref<72x256xf32, #tpu.memory_space<vmem>>, vector<8x256xf32>,
    %c0_36 = arith.constant 0 : index
    %c143 = arith.constant 143 : index
    %53 = vector.load %arg9[%c0_36, %c143] : memref<8x512xf32, #tpu.memory_space<vmem>>, vector<8x256xf32>
    %cst_37 = arith.constant 0.000000e+00 : f32
    %54 = vector.broadcast %cst_37 : f32 to vector<8x256xf32>
    %55 = arith.select %20, %53, %54 : vector<8x256xi1>, vector<8x256xf32>
    %c48 = arith.constant 48 : index
    %c0_38 = arith.constant 0 : index
    %56 = vector.load %arg10[%c48, %c0_38] : memref<72x256xf32, #tpu.memory_space<vmem>>, vector<8x256xf32>
    tpu.vector_store %arg10[%c48, %c0_38], %55 {strides = array<i32>} : memref<72x256xf32, #tpu.memory_space<vmem>>, vector<8x256xf32>,
    %c0_39 = arith.constant 0 : index
    %c144 = arith.constant 144 : index
    %57 = vector.load %arg9[%c0_39, %c144] : memref<8x512xf32, #tpu.memory_space<vmem>>, vector<8x256xf32>
    %c56 = arith.constant 56 : index
    %c0_40 = arith.constant 0 : index
    %58 = vector.load %arg10[%c56, %c0_40] : memref<72x256xf32, #tpu.memory_space<vmem>>, vector<8x256xf32>
    tpu.vector_store %arg10[%c56, %c0_40], %57 {strides = array<i32>} : memref<72x256xf32, #tpu.memory_space<vmem>>, vector<8x256xf32>,
    %c0_41 = arith.constant 0 : index
    %c145 = arith.constant 145 : index
    %59 = vector.load %arg9[%c0_41, %c145] : memref<8x512xf32, #tpu.memory_space<vmem>>, vector<8x256xf32>
    %cst_42 = arith.constant 0.000000e+00 : f32
    %60 = vector.broadcast %cst_42 : f32 to vector<8x256xf32>
    %61 = arith.select %22, %59, %60 : vector<8x256xi1>, vector<8x256xf32>
    %c64 = arith.constant 64 : index
    %c0_43 = arith.constant 0 : index
    %62 = vector.load %arg10[%c64, %c0_43] : memref<72x256xf32, #tpu.memory_space<vmem>>, vector<8x256xf32>
    tpu.vector_store %arg10[%c64, %c0_43], %61 {strides = array<i32>} : memref<72x256xf32, #tpu.memory_space<vmem>>, vector<8x256xf32>,
    %c0_44 = arith.constant 0 : index
    %c0_45 = arith.constant 0 : index
    %63 = vector.load %arg10[%c0_44, %c0_45] : memref<72x256xf32, #tpu.memory_space<vmem>>, vector<72x256xf32>
    %cst_46 = arith.constant dense<0.000000e+00> : vector<8x256xf32>
    %64 = tpu.matmul %30, %63, %cst_46 {dimension_numbers = #tpu.dot_dimension_numbers<[1], [0], [0], [1], [0, 0, 1, 1], [], []>} : vector<8x72xf32>, vector<72x256xf32>, vector<8x256xf32> -> vector<8x256xf32>
    %65 = vector.broadcast %31 : vector<8x1xf32> to vector<8x256xf32>
    %66 = arith.addf %64, %65 : vector<8x256xf32>
    %cst_47 = arith.constant 0.000000e+00 : f32
    %67 = vector.broadcast %cst_47 : f32 to vector<8x256xf32>
    %68 = arith.maximumf %66, %67 : vector<8x256xf32>
    %69 = arith.addf %29, %68 : vector<8x256xf32>
    %c0_48 = arith.constant 0 : index
    %c128_49 = arith.constant 128 : index
    %70 = vector.load %arg9[%c0_48, %c128_49] : memref<8x512xf32, #tpu.memory_space<vmem>>, vector<8x256xf32>
    tpu.vector_store %arg9[%c0_48, %c128_49], %69 {strides = array<i32>} : memref<8x512xf32, #tpu.memory_space<vmem>>, vector<8x256xf32>,
    %c0_50 = arith.constant 0 : index
    %c111_51 = arith.constant 111 : index
    %71 = vector.load %arg9[%c0_50, %c111_51] : memref<8x512xf32, #tpu.memory_space<vmem>>, vector<8x256xf32>
    %cst_52 = arith.constant 0.000000e+00 : f32
    %72 = vector.broadcast %cst_52 : f32 to vector<8x256xf32>
    %73 = arith.select %20, %71, %72 : vector<8x256xi1>, vector<8x256xf32>
    %c0_53 = arith.constant 0 : index
    %c0_54 = arith.constant 0 : index
    %74 = vector.load %arg10[%c0_53, %c0_54] : memref<72x256xf32, #tpu.memory_space<vmem>>, vector<8x256xf32>
    tpu.vector_store %arg10[%c0_53, %c0_54], %73 {strides = array<i32>} : memref<72x256xf32, #tpu.memory_space<vmem>>, vector<8x256xf32>,
    %c0_55 = arith.constant 0 : index
    %c112_56 = arith.constant 112 : index
    %75 = vector.load %arg9[%c0_55, %c112_56] : memref<8x512xf32, #tpu.memory_space<vmem>>, vector<8x256xf32>
    %c8_57 = arith.constant 8 : index
    %c0_58 = arith.constant 0 : index
    %76 = vector.load %arg10[%c8_57, %c0_58] : memref<72x256xf32, #tpu.memory_space<vmem>>, vector<8x256xf32>
    tpu.vector_store %arg10[%c8_57, %c0_58], %75 {strides = array<i32>} : memref<72x256xf32, #tpu.memory_space<vmem>>, vector<8x256xf32>,
    %c0_59 = arith.constant 0 : index
    %c113_60 = arith.constant 113 : index
    %77 = vector.load %arg9[%c0_59, %c113_60] : memref<8x512xf32, #tpu.memory_space<vmem>>, vector<8x256xf32>
    %cst_61 = arith.constant 0.000000e+00 : f32
    %78 = vector.broadcast %cst_61 : f32 to vector<8x256xf32>
    %79 = arith.select %22, %77, %78 : vector<8x256xi1>, vector<8x256xf32>
    %c16_62 = arith.constant 16 : index
    %c0_63 = arith.constant 0 : index
    %80 = vector.load %arg10[%c16_62, %c0_63] : memref<72x256xf32, #tpu.memory_space<vmem>>, vector<8x256xf32>
    tpu.vector_store %arg10[%c16_62, %c0_63], %79 {strides = array<i32>} : memref<72x256xf32, #tpu.memory_space<vmem>>, vector<8x256xf32>,
    %c0_64 = arith.constant 0 : index
    %c127_65 = arith.constant 127 : index
    %81 = vector.load %arg9[%c0_64, %c127_65] : memref<8x512xf32, #tpu.memory_space<vmem>>, vector<8x256xf32>
    %cst_66 = arith.constant 0.000000e+00 : f32
    %82 = vector.broadcast %cst_66 : f32 to vector<8x256xf32>
    %83 = arith.select %20, %81, %82 : vector<8x256xi1>, vector<8x256xf32>
    %c24_67 = arith.constant 24 : index
    %c0_68 = arith.constant 0 : index
    %84 = vector.load %arg10[%c24_67, %c0_68] : memref<72x256xf32, #tpu.memory_space<vmem>>, vector<8x256xf32>
    tpu.vector_store %arg10[%c24_67, %c0_68], %83 {strides = array<i32>} : memref<72x256xf32, #tpu.memory_space<vmem>>, vector<8x256xf32>,
    %c0_69 = arith.constant 0 : index
    %c128_70 = arith.constant 128 : index
    %85 = vector.load %arg9[%c0_69, %c128_70] : memref<8x512xf32, #tpu.memory_space<vmem>>, vector<8x256xf32>
    %c32_71 = arith.constant 32 : index
    %c0_72 = arith.constant 0 : index
    %86 = vector.load %arg10[%c32_71, %c0_72] : memref<72x256xf32, #tpu.memory_space<vmem>>, vector<8x256xf32>
    tpu.vector_store %arg10[%c32_71, %c0_72], %85 {strides = array<i32>} : memref<72x256xf32, #tpu.memory_space<vmem>>, vector<8x256xf32>,
    %c0_73 = arith.constant 0 : index
    %c129_74 = arith.constant 129 : index
    %87 = vector.load %arg9[%c0_73, %c129_74] : memref<8x512xf32, #tpu.memory_space<vmem>>, vector<8x256xf32>
    %cst_75 = arith.constant 0.000000e+00 : f32
    %88 = vector.broadcast %cst_75 : f32 to vector<8x256xf32>
    %89 = arith.select %22, %87, %88 : vector<8x256xi1>, vector<8x256xf32>
    %c40_76 = arith.constant 40 : index
    %c0_77 = arith.constant 0 : index
    %90 = vector.load %arg10[%c40_76, %c0_77] : memref<72x256xf32, #tpu.memory_space<vmem>>, vector<8x256xf32>
    tpu.vector_store %arg10[%c40_76, %c0_77], %89 {strides = array<i32>} : memref<72x256xf32, #tpu.memory_space<vmem>>, vector<8x256xf32>,
    %c0_78 = arith.constant 0 : index
    %c143_79 = arith.constant 143 : index
    %91 = vector.load %arg9[%c0_78, %c143_79] : memref<8x512xf32, #tpu.memory_space<vmem>>, vector<8x256xf32>
    %cst_80 = arith.constant 0.000000e+00 : f32
    %92 = vector.broadcast %cst_80 : f32 to vector<8x256xf32>
    %93 = arith.select %20, %91, %92 : vector<8x256xi1>, vector<8x256xf32>
    %c48_81 = arith.constant 48 : index
    %c0_82 = arith.constant 0 : index
    %94 = vector.load %arg10[%c48_81, %c0_82] : memref<72x256xf32, #tpu.memory_space<vmem>>, vector<8x256xf32>
    tpu.vector_store %arg10[%c48_81, %c0_82], %93 {strides = array<i32>} : memref<72x256xf32, #tpu.memory_space<vmem>>, vector<8x256xf32>,
    %c0_83 = arith.constant 0 : index
    %c144_84 = arith.constant 144 : index
    %95 = vector.load %arg9[%c0_83, %c144_84] : memref<8x512xf32, #tpu.memory_space<vmem>>, vector<8x256xf32>
    %c56_85 = arith.constant 56 : index
    %c0_86 = arith.constant 0 : index
    %96 = vector.load %arg10[%c56_85, %c0_86] : memref<72x256xf32, #tpu.memory_space<vmem>>, vector<8x256xf32>
    tpu.vector_store %arg10[%c56_85, %c0_86], %95 {strides = array<i32>} : memref<72x256xf32, #tpu.memory_space<vmem>>, vector<8x256xf32>,
    %c0_87 = arith.constant 0 : index
    %c145_88 = arith.constant 145 : index
    %97 = vector.load %arg9[%c0_87, %c145_88] : memref<8x512xf32, #tpu.memory_space<vmem>>, vector<8x256xf32>
    %cst_89 = arith.constant 0.000000e+00 : f32
    %98 = vector.broadcast %cst_89 : f32 to vector<8x256xf32>
    %99 = arith.select %22, %97, %98 : vector<8x256xi1>, vector<8x256xf32>
    %c64_90 = arith.constant 64 : index
    %c0_91 = arith.constant 0 : index
    %100 = vector.load %arg10[%c64_90, %c0_91] : memref<72x256xf32, #tpu.memory_space<vmem>>, vector<8x256xf32>
    tpu.vector_store %arg10[%c64_90, %c0_91], %99 {strides = array<i32>} : memref<72x256xf32, #tpu.memory_space<vmem>>, vector<8x256xf32>,
    %c0_92 = arith.constant 0 : index
    %c0_93 = arith.constant 0 : index
    %101 = vector.load %arg10[%c0_92, %c0_93] : memref<72x256xf32, #tpu.memory_space<vmem>>, vector<72x256xf32>
    %cst_94 = arith.constant dense<0.000000e+00> : vector<8x256xf32>
    %102 = tpu.matmul %30, %101, %cst_94 {dimension_numbers = #tpu.dot_dimension_numbers<[1], [0], [0], [1], [0, 0, 1, 1], [], []>} : vector<8x72xf32>, vector<72x256xf32>, vector<8x256xf32> -> vector<8x256xf32>
    %103 = vector.broadcast %31 : vector<8x1xf32> to vector<8x256xf32>
    %104 = arith.addf %102, %103 : vector<8x256xf32>
    %cst_95 = arith.constant 0.000000e+00 : f32
    %105 = vector.broadcast %cst_95 : f32 to vector<8x256xf32>
    %106 = arith.maximumf %104, %105 : vector<8x256xf32>
    %107 = arith.addf %29, %106 : vector<8x256xf32>
    %c0_96 = arith.constant 0 : index
    %c128_97 = arith.constant 128 : index
    %108 = vector.load %arg9[%c0_96, %c128_97] : memref<8x512xf32, #tpu.memory_space<vmem>>, vector<8x256xf32>
    tpu.vector_store %arg9[%c0_96, %c128_97], %107 {strides = array<i32>} : memref<8x512xf32, #tpu.memory_space<vmem>>, vector<8x256xf32>,
    %c0_98 = arith.constant 0 : index
    %c111_99 = arith.constant 111 : index
    %109 = vector.load %arg9[%c0_98, %c111_99] : memref<8x512xf32, #tpu.memory_space<vmem>>, vector<8x256xf32>
    %cst_100 = arith.constant 0.000000e+00 : f32
    %110 = vector.broadcast %cst_100 : f32 to vector<8x256xf32>
    %111 = arith.select %20, %109, %110 : vector<8x256xi1>, vector<8x256xf32>
    %c0_101 = arith.constant 0 : index
    %c0_102 = arith.constant 0 : index
    %112 = vector.load %arg10[%c0_101, %c0_102] : memref<72x256xf32, #tpu.memory_space<vmem>>, vector<8x256xf32>
    tpu.vector_store %arg10[%c0_101, %c0_102], %111 {strides = array<i32>} : memref<72x256xf32, #tpu.memory_space<vmem>>, vector<8x256xf32>,
    %c0_103 = arith.constant 0 : index
    %c112_104 = arith.constant 112 : index
    %113 = vector.load %arg9[%c0_103, %c112_104] : memref<8x512xf32, #tpu.memory_space<vmem>>, vector<8x256xf32>
    %c8_105 = arith.constant 8 : index
    %c0_106 = arith.constant 0 : index
    %114 = vector.load %arg10[%c8_105, %c0_106] : memref<72x256xf32, #tpu.memory_space<vmem>>, vector<8x256xf32>
    tpu.vector_store %arg10[%c8_105, %c0_106], %113 {strides = array<i32>} : memref<72x256xf32, #tpu.memory_space<vmem>>, vector<8x256xf32>,
    %c0_107 = arith.constant 0 : index
    %c113_108 = arith.constant 113 : index
    %115 = vector.load %arg9[%c0_107, %c113_108] : memref<8x512xf32, #tpu.memory_space<vmem>>, vector<8x256xf32>
    %cst_109 = arith.constant 0.000000e+00 : f32
    %116 = vector.broadcast %cst_109 : f32 to vector<8x256xf32>
    %117 = arith.select %22, %115, %116 : vector<8x256xi1>, vector<8x256xf32>
    %c16_110 = arith.constant 16 : index
    %c0_111 = arith.constant 0 : index
    %118 = vector.load %arg10[%c16_110, %c0_111] : memref<72x256xf32, #tpu.memory_space<vmem>>, vector<8x256xf32>
    tpu.vector_store %arg10[%c16_110, %c0_111], %117 {strides = array<i32>} : memref<72x256xf32, #tpu.memory_space<vmem>>, vector<8x256xf32>,
    %c0_112 = arith.constant 0 : index
    %c127_113 = arith.constant 127 : index
    %119 = vector.load %arg9[%c0_112, %c127_113] : memref<8x512xf32, #tpu.memory_space<vmem>>, vector<8x256xf32>
    %cst_114 = arith.constant 0.000000e+00 : f32
    %120 = vector.broadcast %cst_114 : f32 to vector<8x256xf32>
    %121 = arith.select %20, %119, %120 : vector<8x256xi1>, vector<8x256xf32>
    %c24_115 = arith.constant 24 : index
    %c0_116 = arith.constant 0 : index
    %122 = vector.load %arg10[%c24_115, %c0_116] : memref<72x256xf32, #tpu.memory_space<vmem>>, vector<8x256xf32>
    tpu.vector_store %arg10[%c24_115, %c0_116], %121 {strides = array<i32>} : memref<72x256xf32, #tpu.memory_space<vmem>>, vector<8x256xf32>,
    %c0_117 = arith.constant 0 : index
    %c128_118 = arith.constant 128 : index
    %123 = vector.load %arg9[%c0_117, %c128_118] : memref<8x512xf32, #tpu.memory_space<vmem>>, vector<8x256xf32>
    %c32_119 = arith.constant 32 : index
    %c0_120 = arith.constant 0 : index
    %124 = vector.load %arg10[%c32_119, %c0_120] : memref<72x256xf32, #tpu.memory_space<vmem>>, vector<8x256xf32>
    tpu.vector_store %arg10[%c32_119, %c0_120], %123 {strides = array<i32>} : memref<72x256xf32, #tpu.memory_space<vmem>>, vector<8x256xf32>,
    %c0_121 = arith.constant 0 : index
    %c129_122 = arith.constant 129 : index
    %125 = vector.load %arg9[%c0_121, %c129_122] : memref<8x512xf32, #tpu.memory_space<vmem>>, vector<8x256xf32>
    %cst_123 = arith.constant 0.000000e+00 : f32
    %126 = vector.broadcast %cst_123 : f32 to vector<8x256xf32>
    %127 = arith.select %22, %125, %126 : vector<8x256xi1>, vector<8x256xf32>
    %c40_124 = arith.constant 40 : index
    %c0_125 = arith.constant 0 : index
    %128 = vector.load %arg10[%c40_124, %c0_125] : memref<72x256xf32, #tpu.memory_space<vmem>>, vector<8x256xf32>
    tpu.vector_store %arg10[%c40_124, %c0_125], %127 {strides = array<i32>} : memref<72x256xf32, #tpu.memory_space<vmem>>, vector<8x256xf32>,
    %c0_126 = arith.constant 0 : index
    %c143_127 = arith.constant 143 : index
    %129 = vector.load %arg9[%c0_126, %c143_127] : memref<8x512xf32, #tpu.memory_space<vmem>>, vector<8x256xf32>
    %cst_128 = arith.constant 0.000000e+00 : f32
    %130 = vector.broadcast %cst_128 : f32 to vector<8x256xf32>
    %131 = arith.select %20, %129, %130 : vector<8x256xi1>, vector<8x256xf32>
    %c48_129 = arith.constant 48 : index
    %c0_130 = arith.constant 0 : index
    %132 = vector.load %arg10[%c48_129, %c0_130] : memref<72x256xf32, #tpu.memory_space<vmem>>, vector<8x256xf32>
    tpu.vector_store %arg10[%c48_129, %c0_130], %131 {strides = array<i32>} : memref<72x256xf32, #tpu.memory_space<vmem>>, vector<8x256xf32>,
    %c0_131 = arith.constant 0 : index
    %c144_132 = arith.constant 144 : index
    %133 = vector.load %arg9[%c0_131, %c144_132] : memref<8x512xf32, #tpu.memory_space<vmem>>, vector<8x256xf32>
    %c56_133 = arith.constant 56 : index
    %c0_134 = arith.constant 0 : index
    %134 = vector.load %arg10[%c56_133, %c0_134] : memref<72x256xf32, #tpu.memory_space<vmem>>, vector<8x256xf32>
    tpu.vector_store %arg10[%c56_133, %c0_134], %133 {strides = array<i32>} : memref<72x256xf32, #tpu.memory_space<vmem>>, vector<8x256xf32>,
    %c0_135 = arith.constant 0 : index
    %c145_136 = arith.constant 145 : index
    %135 = vector.load %arg9[%c0_135, %c145_136] : memref<8x512xf32, #tpu.memory_space<vmem>>, vector<8x256xf32>
    %cst_137 = arith.constant 0.000000e+00 : f32
    %136 = vector.broadcast %cst_137 : f32 to vector<8x256xf32>
    %137 = arith.select %22, %135, %136 : vector<8x256xi1>, vector<8x256xf32>
    %c64_138 = arith.constant 64 : index
    %c0_139 = arith.constant 0 : index
    %138 = vector.load %arg10[%c64_138, %c0_139] : memref<72x256xf32, #tpu.memory_space<vmem>>, vector<8x256xf32>
    tpu.vector_store %arg10[%c64_138, %c0_139], %137 {strides = array<i32>} : memref<72x256xf32, #tpu.memory_space<vmem>>, vector<8x256xf32>,
    %c0_140 = arith.constant 0 : index
    %c0_141 = arith.constant 0 : index
    %139 = vector.load %arg10[%c0_140, %c0_141] : memref<72x256xf32, #tpu.memory_space<vmem>>, vector<72x256xf32>
    %cst_142 = arith.constant dense<0.000000e+00> : vector<8x256xf32>
    %140 = tpu.matmul %30, %139, %cst_142 {dimension_numbers = #tpu.dot_dimension_numbers<[1], [0], [0], [1], [0, 0, 1, 1], [], []>} : vector<8x72xf32>, vector<72x256xf32>, vector<8x256xf32> -> vector<8x256xf32>
    %141 = vector.broadcast %31 : vector<8x1xf32> to vector<8x256xf32>
    %142 = arith.addf %140, %141 : vector<8x256xf32>
    %cst_143 = arith.constant 0.000000e+00 : f32
    %143 = vector.broadcast %cst_143 : f32 to vector<8x256xf32>
    %144 = arith.maximumf %142, %143 : vector<8x256xf32>
    %c0_144 = arith.constant 0 : index
    %c0_145 = arith.constant 0 : index
    %145 = vector.load %arg6[%c0_144, %c0_145] : memref<8x72xf32, #tpu.memory_space<vmem>>, vector<8x72xf32>
    %c0_146 = arith.constant 0 : index
    %c0_147 = arith.constant 0 : index
    %146 = vector.load %arg7[%c0_146, %c0_147] : memref<8x1xf32, #tpu.memory_space<vmem>>, vector<8x1xf32>
    %c0_148 = arith.constant 0 : index
    %c128_149 = arith.constant 128 : index
    %147 = vector.load %arg9[%c0_148, %c128_149] : memref<8x512xf32, #tpu.memory_space<vmem>>, vector<8x256xf32>
    tpu.vector_store %arg9[%c0_148, %c128_149], %144 {strides = array<i32>} : memref<8x512xf32, #tpu.memory_space<vmem>>, vector<8x256xf32>,
    %c0_150 = arith.constant 0 : index
    %c111_151 = arith.constant 111 : index
    %148 = vector.load %arg9[%c0_150, %c111_151] : memref<8x512xf32, #tpu.memory_space<vmem>>, vector<8x256xf32>
    %cst_152 = arith.constant 0.000000e+00 : f32
    %149 = vector.broadcast %cst_152 : f32 to vector<8x256xf32>
    %150 = arith.select %20, %148, %149 : vector<8x256xi1>, vector<8x256xf32>
    %c0_153 = arith.constant 0 : index
    %c0_154 = arith.constant 0 : index
    %151 = vector.load %arg10[%c0_153, %c0_154] : memref<72x256xf32, #tpu.memory_space<vmem>>, vector<8x256xf32>
    tpu.vector_store %arg10[%c0_153, %c0_154], %150 {strides = array<i32>} : memref<72x256xf32, #tpu.memory_space<vmem>>, vector<8x256xf32>,
    %c0_155 = arith.constant 0 : index
    %c112_156 = arith.constant 112 : index
    %152 = vector.load %arg9[%c0_155, %c112_156] : memref<8x512xf32, #tpu.memory_space<vmem>>, vector<8x256xf32>
    %c8_157 = arith.constant 8 : index
    %c0_158 = arith.constant 0 : index
    %153 = vector.load %arg10[%c8_157, %c0_158] : memref<72x256xf32, #tpu.memory_space<vmem>>, vector<8x256xf32>
    tpu.vector_store %arg10[%c8_157, %c0_158], %152 {strides = array<i32>} : memref<72x256xf32, #tpu.memory_space<vmem>>, vector<8x256xf32>,
    %c0_159 = arith.constant 0 : index
    %c113_160 = arith.constant 113 : index
    %154 = vector.load %arg9[%c0_159, %c113_160] : memref<8x512xf32, #tpu.memory_space<vmem>>, vector<8x256xf32>
    %cst_161 = arith.constant 0.000000e+00 : f32
    %155 = vector.broadcast %cst_161 : f32 to vector<8x256xf32>
    %156 = arith.select %22, %154, %155 : vector<8x256xi1>, vector<8x256xf32>
    %c16_162 = arith.constant 16 : index
    %c0_163 = arith.constant 0 : index
    %157 = vector.load %arg10[%c16_162, %c0_163] : memref<72x256xf32, #tpu.memory_space<vmem>>, vector<8x256xf32>
    tpu.vector_store %arg10[%c16_162, %c0_163], %156 {strides = array<i32>} : memref<72x256xf32, #tpu.memory_space<vmem>>, vector<8x256xf32>,
    %c0_164 = arith.constant 0 : index
    %c127_165 = arith.constant 127 : index
    %158 = vector.load %arg9[%c0_164, %c127_165] : memref<8x512xf32, #tpu.memory_space<vmem>>, vector<8x256xf32>
    %cst_166 = arith.constant 0.000000e+00 : f32
    %159 = vector.broadcast %cst_166 : f32 to vector<8x256xf32>
    %160 = arith.select %20, %158, %159 : vector<8x256xi1>, vector<8x256xf32>
    %c24_167 = arith.constant 24 : index
    %c0_168 = arith.constant 0 : index
    %161 = vector.load %arg10[%c24_167, %c0_168] : memref<72x256xf32, #tpu.memory_space<vmem>>, vector<8x256xf32>
    tpu.vector_store %arg10[%c24_167, %c0_168], %160 {strides = array<i32>} : memref<72x256xf32, #tpu.memory_space<vmem>>, vector<8x256xf32>,
    %c0_169 = arith.constant 0 : index
    %c128_170 = arith.constant 128 : index
    %162 = vector.load %arg9[%c0_169, %c128_170] : memref<8x512xf32, #tpu.memory_space<vmem>>, vector<8x256xf32>
    %c32_171 = arith.constant 32 : index
    %c0_172 = arith.constant 0 : index
    %163 = vector.load %arg10[%c32_171, %c0_172] : memref<72x256xf32, #tpu.memory_space<vmem>>, vector<8x256xf32>
    tpu.vector_store %arg10[%c32_171, %c0_172], %162 {strides = array<i32>} : memref<72x256xf32, #tpu.memory_space<vmem>>, vector<8x256xf32>,
    %c0_173 = arith.constant 0 : index
    %c129_174 = arith.constant 129 : index
    %164 = vector.load %arg9[%c0_173, %c129_174] : memref<8x512xf32, #tpu.memory_space<vmem>>, vector<8x256xf32>
    %cst_175 = arith.constant 0.000000e+00 : f32
    %165 = vector.broadcast %cst_175 : f32 to vector<8x256xf32>
    %166 = arith.select %22, %164, %165 : vector<8x256xi1>, vector<8x256xf32>
    %c40_176 = arith.constant 40 : index
    %c0_177 = arith.constant 0 : index
    %167 = vector.load %arg10[%c40_176, %c0_177] : memref<72x256xf32, #tpu.memory_space<vmem>>, vector<8x256xf32>
    tpu.vector_store %arg10[%c40_176, %c0_177], %166 {strides = array<i32>} : memref<72x256xf32, #tpu.memory_space<vmem>>, vector<8x256xf32>,
    %c0_178 = arith.constant 0 : index
    %c143_179 = arith.constant 143 : index
    %168 = vector.load %arg9[%c0_178, %c143_179] : memref<8x512xf32, #tpu.memory_space<vmem>>, vector<8x256xf32>
    %cst_180 = arith.constant 0.000000e+00 : f32
    %169 = vector.broadcast %cst_180 : f32 to vector<8x256xf32>
    %170 = arith.select %20, %168, %169 : vector<8x256xi1>, vector<8x256xf32>
    %c48_181 = arith.constant 48 : index
    %c0_182 = arith.constant 0 : index
    %171 = vector.load %arg10[%c48_181, %c0_182] : memref<72x256xf32, #tpu.memory_space<vmem>>, vector<8x256xf32>
    tpu.vector_store %arg10[%c48_181, %c0_182], %170 {strides = array<i32>} : memref<72x256xf32, #tpu.memory_space<vmem>>, vector<8x256xf32>,
    %c0_183 = arith.constant 0 : index
    %c144_184 = arith.constant 144 : index
    %172 = vector.load %arg9[%c0_183, %c144_184] : memref<8x512xf32, #tpu.memory_space<vmem>>, vector<8x256xf32>
    %c56_185 = arith.constant 56 : index
    %c0_186 = arith.constant 0 : index
    %173 = vector.load %arg10[%c56_185, %c0_186] : memref<72x256xf32, #tpu.memory_space<vmem>>, vector<8x256xf32>
    tpu.vector_store %arg10[%c56_185, %c0_186], %172 {strides = array<i32>} : memref<72x256xf32, #tpu.memory_space<vmem>>, vector<8x256xf32>,
    %c0_187 = arith.constant 0 : index
    %c145_188 = arith.constant 145 : index
    %174 = vector.load %arg9[%c0_187, %c145_188] : memref<8x512xf32, #tpu.memory_space<vmem>>, vector<8x256xf32>
    %cst_189 = arith.constant 0.000000e+00 : f32
    %175 = vector.broadcast %cst_189 : f32 to vector<8x256xf32>
    %176 = arith.select %22, %174, %175 : vector<8x256xi1>, vector<8x256xf32>
    %c64_190 = arith.constant 64 : index
    %c0_191 = arith.constant 0 : index
    %177 = vector.load %arg10[%c64_190, %c0_191] : memref<72x256xf32, #tpu.memory_space<vmem>>, vector<8x256xf32>
    tpu.vector_store %arg10[%c64_190, %c0_191], %176 {strides = array<i32>} : memref<72x256xf32, #tpu.memory_space<vmem>>, vector<8x256xf32>,
    %c0_192 = arith.constant 0 : index
    %c0_193 = arith.constant 0 : index
    %178 = vector.load %arg10[%c0_192, %c0_193] : memref<72x256xf32, #tpu.memory_space<vmem>>, vector<72x256xf32>
    %cst_194 = arith.constant dense<0.000000e+00> : vector<8x256xf32>
    %179 = tpu.matmul %145, %178, %cst_194 {dimension_numbers = #tpu.dot_dimension_numbers<[1], [0], [0], [1], [0, 0, 1, 1], [], []>} : vector<8x72xf32>, vector<72x256xf32>, vector<8x256xf32> -> vector<8x256xf32>
    %180 = vector.broadcast %146 : vector<8x1xf32> to vector<8x256xf32>
    %181 = arith.addf %179, %180 : vector<8x256xf32>
    %cst_195 = arith.constant 0.000000e+00 : f32
    %182 = vector.broadcast %cst_195 : f32 to vector<8x256xf32>
    %183 = arith.maximumf %181, %182 : vector<8x256xf32>
    %184 = arith.addf %144, %183 : vector<8x256xf32>
    %c0_196 = arith.constant 0 : index
    %c128_197 = arith.constant 128 : index
    %185 = vector.load %arg9[%c0_196, %c128_197] : memref<8x512xf32, #tpu.memory_space<vmem>>, vector<8x256xf32>
    tpu.vector_store %arg9[%c0_196, %c128_197], %184 {strides = array<i32>} : memref<8x512xf32, #tpu.memory_space<vmem>>, vector<8x256xf32>,
    %c0_198 = arith.constant 0 : index
    %c111_199 = arith.constant 111 : index
    %186 = vector.load %arg9[%c0_198, %c111_199] : memref<8x512xf32, #tpu.memory_space<vmem>>, vector<8x256xf32>
    %cst_200 = arith.constant 0.000000e+00 : f32
    %187 = vector.broadcast %cst_200 : f32 to vector<8x256xf32>
    %188 = arith.select %20, %186, %187 : vector<8x256xi1>, vector<8x256xf32>
    %c0_201 = arith.constant 0 : index
    %c0_202 = arith.constant 0 : index
    %189 = vector.load %arg10[%c0_201, %c0_202] : memref<72x256xf32, #tpu.memory_space<vmem>>, vector<8x256xf32>
    tpu.vector_store %arg10[%c0_201, %c0_202], %188 {strides = array<i32>} : memref<72x256xf32, #tpu.memory_space<vmem>>, vector<8x256xf32>,
    %c0_203 = arith.constant 0 : index
    %c112_204 = arith.constant 112 : index
    %190 = vector.load %arg9[%c0_203, %c112_204] : memref<8x512xf32, #tpu.memory_space<vmem>>, vector<8x256xf32>
    %c8_205 = arith.constant 8 : index
    %c0_206 = arith.constant 0 : index
    %191 = vector.load %arg10[%c8_205, %c0_206] : memref<72x256xf32, #tpu.memory_space<vmem>>, vector<8x256xf32>
    tpu.vector_store %arg10[%c8_205, %c0_206], %190 {strides = array<i32>} : memref<72x256xf32, #tpu.memory_space<vmem>>, vector<8x256xf32>,
    %c0_207 = arith.constant 0 : index
    %c113_208 = arith.constant 113 : index
    %192 = vector.load %arg9[%c0_207, %c113_208] : memref<8x512xf32, #tpu.memory_space<vmem>>, vector<8x256xf32>
    %cst_209 = arith.constant 0.000000e+00 : f32
    %193 = vector.broadcast %cst_209 : f32 to vector<8x256xf32>
    %194 = arith.select %22, %192, %193 : vector<8x256xi1>, vector<8x256xf32>
    %c16_210 = arith.constant 16 : index
    %c0_211 = arith.constant 0 : index
    %195 = vector.load %arg10[%c16_210, %c0_211] : memref<72x256xf32, #tpu.memory_space<vmem>>, vector<8x256xf32>
    tpu.vector_store %arg10[%c16_210, %c0_211], %194 {strides = array<i32>} : memref<72x256xf32, #tpu.memory_space<vmem>>, vector<8x256xf32>,
    %c0_212 = arith.constant 0 : index
    %c127_213 = arith.constant 127 : index
    %196 = vector.load %arg9[%c0_212, %c127_213] : memref<8x512xf32, #tpu.memory_space<vmem>>, vector<8x256xf32>
    %cst_214 = arith.constant 0.000000e+00 : f32
    %197 = vector.broadcast %cst_214 : f32 to vector<8x256xf32>
    %198 = arith.select %20, %196, %197 : vector<8x256xi1>, vector<8x256xf32>
    %c24_215 = arith.constant 24 : index
    %c0_216 = arith.constant 0 : index
    %199 = vector.load %arg10[%c24_215, %c0_216] : memref<72x256xf32, #tpu.memory_space<vmem>>, vector<8x256xf32>
    tpu.vector_store %arg10[%c24_215, %c0_216], %198 {strides = array<i32>} : memref<72x256xf32, #tpu.memory_space<vmem>>, vector<8x256xf32>,
    %c0_217 = arith.constant 0 : index
    %c128_218 = arith.constant 128 : index
    %200 = vector.load %arg9[%c0_217, %c128_218] : memref<8x512xf32, #tpu.memory_space<vmem>>, vector<8x256xf32>
    %c32_219 = arith.constant 32 : index
    %c0_220 = arith.constant 0 : index
    %201 = vector.load %arg10[%c32_219, %c0_220] : memref<72x256xf32, #tpu.memory_space<vmem>>, vector<8x256xf32>
    tpu.vector_store %arg10[%c32_219, %c0_220], %200 {strides = array<i32>} : memref<72x256xf32, #tpu.memory_space<vmem>>, vector<8x256xf32>,
    %c0_221 = arith.constant 0 : index
    %c129_222 = arith.constant 129 : index
    %202 = vector.load %arg9[%c0_221, %c129_222] : memref<8x512xf32, #tpu.memory_space<vmem>>, vector<8x256xf32>
    %cst_223 = arith.constant 0.000000e+00 : f32
    %203 = vector.broadcast %cst_223 : f32 to vector<8x256xf32>
    %204 = arith.select %22, %202, %203 : vector<8x256xi1>, vector<8x256xf32>
    %c40_224 = arith.constant 40 : index
    %c0_225 = arith.constant 0 : index
    %205 = vector.load %arg10[%c40_224, %c0_225] : memref<72x256xf32, #tpu.memory_space<vmem>>, vector<8x256xf32>
    tpu.vector_store %arg10[%c40_224, %c0_225], %204 {strides = array<i32>} : memref<72x256xf32, #tpu.memory_space<vmem>>, vector<8x256xf32>,
    %c0_226 = arith.constant 0 : index
    %c143_227 = arith.constant 143 : index
    %206 = vector.load %arg9[%c0_226, %c143_227] : memref<8x512xf32, #tpu.memory_space<vmem>>, vector<8x256xf32>
    %cst_228 = arith.constant 0.000000e+00 : f32
    %207 = vector.broadcast %cst_228 : f32 to vector<8x256xf32>
    %208 = arith.select %20, %206, %207 : vector<8x256xi1>, vector<8x256xf32>
    %c48_229 = arith.constant 48 : index
    %c0_230 = arith.constant 0 : index
    %209 = vector.load %arg10[%c48_229, %c0_230] : memref<72x256xf32, #tpu.memory_space<vmem>>, vector<8x256xf32>
    tpu.vector_store %arg10[%c48_229, %c0_230], %208 {strides = array<i32>} : memref<72x256xf32, #tpu.memory_space<vmem>>, vector<8x256xf32>,
    %c0_231 = arith.constant 0 : index
    %c144_232 = arith.constant 144 : index
    %210 = vector.load %arg9[%c0_231, %c144_232] : memref<8x512xf32, #tpu.memory_space<vmem>>, vector<8x256xf32>
    %c56_233 = arith.constant 56 : index
    %c0_234 = arith.constant 0 : index
    %211 = vector.load %arg10[%c56_233, %c0_234] : memref<72x256xf32, #tpu.memory_space<vmem>>, vector<8x256xf32>
    tpu.vector_store %arg10[%c56_233, %c0_234], %210 {strides = array<i32>} : memref<72x256xf32, #tpu.memory_space<vmem>>, vector<8x256xf32>,
    %c0_235 = arith.constant 0 : index
    %c145_236 = arith.constant 145 : index
    %212 = vector.load %arg9[%c0_235, %c145_236] : memref<8x512xf32, #tpu.memory_space<vmem>>, vector<8x256xf32>
    %cst_237 = arith.constant 0.000000e+00 : f32
    %213 = vector.broadcast %cst_237 : f32 to vector<8x256xf32>
    %214 = arith.select %22, %212, %213 : vector<8x256xi1>, vector<8x256xf32>
    %c64_238 = arith.constant 64 : index
    %c0_239 = arith.constant 0 : index
    %215 = vector.load %arg10[%c64_238, %c0_239] : memref<72x256xf32, #tpu.memory_space<vmem>>, vector<8x256xf32>
    tpu.vector_store %arg10[%c64_238, %c0_239], %214 {strides = array<i32>} : memref<72x256xf32, #tpu.memory_space<vmem>>, vector<8x256xf32>,
    %c0_240 = arith.constant 0 : index
    %c0_241 = arith.constant 0 : index
    %216 = vector.load %arg10[%c0_240, %c0_241] : memref<72x256xf32, #tpu.memory_space<vmem>>, vector<72x256xf32>
    %cst_242 = arith.constant dense<0.000000e+00> : vector<8x256xf32>
    %217 = tpu.matmul %145, %216, %cst_242 {dimension_numbers = #tpu.dot_dimension_numbers<[1], [0], [0], [1], [0, 0, 1, 1], [], []>} : vector<8x72xf32>, vector<72x256xf32>, vector<8x256xf32> -> vector<8x256xf32>
    %218 = vector.broadcast %146 : vector<8x1xf32> to vector<8x256xf32>
    %219 = arith.addf %217, %218 : vector<8x256xf32>
    %cst_243 = arith.constant 0.000000e+00 : f32
    %220 = vector.broadcast %cst_243 : f32 to vector<8x256xf32>
    %221 = arith.maximumf %219, %220 : vector<8x256xf32>
    %222 = arith.addf %144, %221 : vector<8x256xf32>
    %c0_244 = arith.constant 0 : index
    %c128_245 = arith.constant 128 : index
    %223 = vector.load %arg9[%c0_244, %c128_245] : memref<8x512xf32, #tpu.memory_space<vmem>>, vector<8x256xf32>
    tpu.vector_store %arg9[%c0_244, %c128_245], %222 {strides = array<i32>} : memref<8x512xf32, #tpu.memory_space<vmem>>, vector<8x256xf32>,
    %c0_246 = arith.constant 0 : index
    %c111_247 = arith.constant 111 : index
    %224 = vector.load %arg9[%c0_246, %c111_247] : memref<8x512xf32, #tpu.memory_space<vmem>>, vector<8x256xf32>
    %cst_248 = arith.constant 0.000000e+00 : f32
    %225 = vector.broadcast %cst_248 : f32 to vector<8x256xf32>
    %226 = arith.select %20, %224, %225 : vector<8x256xi1>, vector<8x256xf32>
    %c0_249 = arith.constant 0 : index
    %c0_250 = arith.constant 0 : index
    %227 = vector.load %arg10[%c0_249, %c0_250] : memref<72x256xf32, #tpu.memory_space<vmem>>, vector<8x256xf32>
    tpu.vector_store %arg10[%c0_249, %c0_250], %226 {strides = array<i32>} : memref<72x256xf32, #tpu.memory_space<vmem>>, vector<8x256xf32>,
    %c0_251 = arith.constant 0 : index
    %c112_252 = arith.constant 112 : index
    %228 = vector.load %arg9[%c0_251, %c112_252] : memref<8x512xf32, #tpu.memory_space<vmem>>, vector<8x256xf32>
    %c8_253 = arith.constant 8 : index
    %c0_254 = arith.constant 0 : index
    %229 = vector.load %arg10[%c8_253, %c0_254] : memref<72x256xf32, #tpu.memory_space<vmem>>, vector<8x256xf32>
    tpu.vector_store %arg10[%c8_253, %c0_254], %228 {strides = array<i32>} : memref<72x256xf32, #tpu.memory_space<vmem>>, vector<8x256xf32>,
    %c0_255 = arith.constant 0 : index
    %c113_256 = arith.constant 113 : index
    %230 = vector.load %arg9[%c0_255, %c113_256] : memref<8x512xf32, #tpu.memory_space<vmem>>, vector<8x256xf32>
    %cst_257 = arith.constant 0.000000e+00 : f32
    %231 = vector.broadcast %cst_257 : f32 to vector<8x256xf32>
    %232 = arith.select %22, %230, %231 : vector<8x256xi1>, vector<8x256xf32>
    %c16_258 = arith.constant 16 : index
    %c0_259 = arith.constant 0 : index
    %233 = vector.load %arg10[%c16_258, %c0_259] : memref<72x256xf32, #tpu.memory_space<vmem>>, vector<8x256xf32>
    tpu.vector_store %arg10[%c16_258, %c0_259], %232 {strides = array<i32>} : memref<72x256xf32, #tpu.memory_space<vmem>>, vector<8x256xf32>,
    %c0_260 = arith.constant 0 : index
    %c127_261 = arith.constant 127 : index
    %234 = vector.load %arg9[%c0_260, %c127_261] : memref<8x512xf32, #tpu.memory_space<vmem>>, vector<8x256xf32>
    %cst_262 = arith.constant 0.000000e+00 : f32
    %235 = vector.broadcast %cst_262 : f32 to vector<8x256xf32>
    %236 = arith.select %20, %234, %235 : vector<8x256xi1>, vector<8x256xf32>
    %c24_263 = arith.constant 24 : index
    %c0_264 = arith.constant 0 : index
    %237 = vector.load %arg10[%c24_263, %c0_264] : memref<72x256xf32, #tpu.memory_space<vmem>>, vector<8x256xf32>
    tpu.vector_store %arg10[%c24_263, %c0_264], %236 {strides = array<i32>} : memref<72x256xf32, #tpu.memory_space<vmem>>, vector<8x256xf32>,
    %c0_265 = arith.constant 0 : index
    %c128_266 = arith.constant 128 : index
    %238 = vector.load %arg9[%c0_265, %c128_266] : memref<8x512xf32, #tpu.memory_space<vmem>>, vector<8x256xf32>
    %c32_267 = arith.constant 32 : index
    %c0_268 = arith.constant 0 : index
    %239 = vector.load %arg10[%c32_267, %c0_268] : memref<72x256xf32, #tpu.memory_space<vmem>>, vector<8x256xf32>
    tpu.vector_store %arg10[%c32_267, %c0_268], %238 {strides = array<i32>} : memref<72x256xf32, #tpu.memory_space<vmem>>, vector<8x256xf32>,
    %c0_269 = arith.constant 0 : index
    %c129_270 = arith.constant 129 : index
    %240 = vector.load %arg9[%c0_269, %c129_270] : memref<8x512xf32, #tpu.memory_space<vmem>>, vector<8x256xf32>
    %cst_271 = arith.constant 0.000000e+00 : f32
    %241 = vector.broadcast %cst_271 : f32 to vector<8x256xf32>
    %242 = arith.select %22, %240, %241 : vector<8x256xi1>, vector<8x256xf32>
    %c40_272 = arith.constant 40 : index
    %c0_273 = arith.constant 0 : index
    %243 = vector.load %arg10[%c40_272, %c0_273] : memref<72x256xf32, #tpu.memory_space<vmem>>, vector<8x256xf32>
    tpu.vector_store %arg10[%c40_272, %c0_273], %242 {strides = array<i32>} : memref<72x256xf32, #tpu.memory_space<vmem>>, vector<8x256xf32>,
    %c0_274 = arith.constant 0 : index
    %c143_275 = arith.constant 143 : index
    %244 = vector.load %arg9[%c0_274, %c143_275] : memref<8x512xf32, #tpu.memory_space<vmem>>, vector<8x256xf32>
    %cst_276 = arith.constant 0.000000e+00 : f32
    %245 = vector.broadcast %cst_276 : f32 to vector<8x256xf32>
    %246 = arith.select %20, %244, %245 : vector<8x256xi1>, vector<8x256xf32>
    %c48_277 = arith.constant 48 : index
    %c0_278 = arith.constant 0 : index
    %247 = vector.load %arg10[%c48_277, %c0_278] : memref<72x256xf32, #tpu.memory_space<vmem>>, vector<8x256xf32>
    tpu.vector_store %arg10[%c48_277, %c0_278], %246 {strides = array<i32>} : memref<72x256xf32, #tpu.memory_space<vmem>>, vector<8x256xf32>,
    %c0_279 = arith.constant 0 : index
    %c144_280 = arith.constant 144 : index
    %248 = vector.load %arg9[%c0_279, %c144_280] : memref<8x512xf32, #tpu.memory_space<vmem>>, vector<8x256xf32>
    %c56_281 = arith.constant 56 : index
    %c0_282 = arith.constant 0 : index
    %249 = vector.load %arg10[%c56_281, %c0_282] : memref<72x256xf32, #tpu.memory_space<vmem>>, vector<8x256xf32>
    tpu.vector_store %arg10[%c56_281, %c0_282], %248 {strides = array<i32>} : memref<72x256xf32, #tpu.memory_space<vmem>>, vector<8x256xf32>,
    %c0_283 = arith.constant 0 : index
    %c145_284 = arith.constant 145 : index
    %250 = vector.load %arg9[%c0_283, %c145_284] : memref<8x512xf32, #tpu.memory_space<vmem>>, vector<8x256xf32>
    %cst_285 = arith.constant 0.000000e+00 : f32
    %251 = vector.broadcast %cst_285 : f32 to vector<8x256xf32>
    %252 = arith.select %22, %250, %251 : vector<8x256xi1>, vector<8x256xf32>
    %c64_286 = arith.constant 64 : index
    %c0_287 = arith.constant 0 : index
    %253 = vector.load %arg10[%c64_286, %c0_287] : memref<72x256xf32, #tpu.memory_space<vmem>>, vector<8x256xf32>
    tpu.vector_store %arg10[%c64_286, %c0_287], %252 {strides = array<i32>} : memref<72x256xf32, #tpu.memory_space<vmem>>, vector<8x256xf32>,
    %c0_288 = arith.constant 0 : index
    %c0_289 = arith.constant 0 : index
    %254 = vector.load %arg10[%c0_288, %c0_289] : memref<72x256xf32, #tpu.memory_space<vmem>>, vector<72x256xf32>
    %cst_290 = arith.constant dense<0.000000e+00> : vector<8x256xf32>
    %255 = tpu.matmul %145, %254, %cst_290 {dimension_numbers = #tpu.dot_dimension_numbers<[1], [0], [0], [1], [0, 0, 1, 1], [], []>} : vector<8x72xf32>, vector<72x256xf32>, vector<8x256xf32> -> vector<8x256xf32>
    %256 = vector.broadcast %146 : vector<8x1xf32> to vector<8x256xf32>
    %257 = arith.addf %255, %256 : vector<8x256xf32>
    %cst_291 = arith.constant 0.000000e+00 : f32
    %258 = vector.broadcast %cst_291 : f32 to vector<8x256xf32>
    %259 = arith.maximumf %257, %258 : vector<8x256xf32>
    %260 = arith.addf %29, %259 : vector<8x256xf32>
    %c0_292 = arith.constant 0 : index
    %c0_293 = arith.constant 0 : index
    %c0_294 = arith.constant 0 : index
    %261 = vector.load %arg8[%c0_292, %c0_293, %c0_294] : memref<1x8x256xf32, #tpu.memory_space<vmem>>, vector<1x8x256xf32>
    %262 = vector.shape_cast %261 : vector<1x8x256xf32> to vector<8x256xf32>
    %263 = vector.shape_cast %260 : vector<8x256xf32> to vector<1x8x256xf32>
    tpu.vector_store %arg8[%c0_292, %c0_293, %c0_294], %263 {strides = array<i32>} : memref<1x8x256xf32, #tpu.memory_space<vmem>>, vector<1x8x256xf32>,
    return
  }
  func.func @transform_0(%arg0: i32) -> (i32, i32, i32) {
    %c0_i32 = arith.constant 0 : i32
    %c0_i32_0 = arith.constant 0 : i32
    %c0_i32_1 = arith.constant 0 : i32
    return %arg0, %c0_i32, %c0_i32_0 : i32, i32, i32
  }
  func.func @transform_1(%arg0: i32) -> (i32, i32) {
    %c0_i32 = arith.constant 0 : i32
    %c0_i32_0 = arith.constant 0 : i32
    %c0_i32_1 = arith.constant 0 : i32
    return %c0_i32, %c0_i32_0 : i32, i32
  }
  func.func @transform_2(%arg0: i32) -> (i32, i32) {
    %c0_i32 = arith.constant 0 : i32
    %c0_i32_0 = arith.constant 0 : i32
    %c0_i32_1 = arith.constant 0 : i32
    return %c0_i32, %c0_i32_0 : i32, i32
  }
  func.func @transform_3(%arg0: i32) -> (i32, i32) {
    %c0_i32 = arith.constant 0 : i32
    %c0_i32_0 = arith.constant 0 : i32
    %c0_i32_1 = arith.constant 0 : i32
    return %c0_i32, %c0_i32_0 : i32, i32
  }
  func.func @transform_4(%arg0: i32) -> (i32, i32) {
    %c0_i32 = arith.constant 0 : i32
    %c0_i32_0 = arith.constant 0 : i32
    %c0_i32_1 = arith.constant 0 : i32
    return %c0_i32, %c0_i32_0 : i32, i32
  }
  func.func @transform_5(%arg0: i32) -> (i32, i32) {
    %c0_i32 = arith.constant 0 : i32
    %c0_i32_0 = arith.constant 0 : i32
    %c0_i32_1 = arith.constant 0 : i32
    return %c0_i32, %c0_i32_0 : i32, i32
  }
  func.func @transform_6(%arg0: i32) -> (i32, i32) {
    %c0_i32 = arith.constant 0 : i32
    %c0_i32_0 = arith.constant 0 : i32
    %c0_i32_1 = arith.constant 0 : i32
    return %c0_i32, %c0_i32_0 : i32, i32
  }
  func.func @transform_7(%arg0: i32) -> (i32, i32, i32) {
    %c0_i32 = arith.constant 0 : i32
    %c0_i32_0 = arith.constant 0 : i32
    %c0_i32_1 = arith.constant 0 : i32
    return %arg0, %c0_i32, %c0_i32_0 : i32, i32, i32
  }
}

</mosaic_0001>

<bundles_post_ra>
// kernel: rrcnn_block_forward.1
= control target key start
LH: loop header
LB: loop body
LE: loop exit
PB: predicated region body
PF: predicated region fallthrough
CT: control target
= control target key end

     0   :  { %s2546_s24 = smov 0   ;;  %s3132_s0 = inlined_call_operand.vmem [shape: f32[2,4,256], index: 0, kind: input, shape index: {}]   ;;  %s3133_s1 = inlined_call_operand.vmem [shape: f32[8,4], index: 1, kind: input, shape index: {}]   ;;  %s3134_s2 = inlined_call_operand.vmem [shape: f32[8,1], index: 2, kind: input, shape index: {}]   ;;  %s3135_s3 = inlined_call_operand.vmem [shape: f32[8,72], index: 3, kind: input, shape index: {}]   ;;  %s3136_s4 = inlined_call_operand.vmem [shape: f32[8,1], index: 4, kind: input, shape index: {}]   ;;  %s3137_s5 = inlined_call_operand.vmem [shape: f32[8,72], index: 5, kind: input, shape index: {}]   ;;  %s3138_s6 = inlined_call_operand.vmem [shape: f32[8,1], index: 6, kind: input, shape index: {}]   ;;  %s3139_s7 = inlined_call_operand.vmem [shape: f32[2,8,256], index: 7, kind: output, shape index: {}]  }
   0x1 LB: > { %s2018_s25 = sadd.s32 4294967295, %s2493_s24   ;;  %p2022_p0 = scmp.ge.s32.totalorder %s2493_s24, 1  ;;  %s2493_s24 = sphi %s2546_s24, %s17_s24  }
   0x2   : > { %p237_p1 = scmp.lt.s32.totalorder %s2493_s24, 3 }
   0x4   : > { %p238_p2 = pnand %p2022_p0, %p237_p1 }
   0x5   : > { %p269_p3 = scmp.lt.s32.totalorder (!%p238_p2), %s2018_s25, 1  ;;  %v2495_v0 = vmov (!%p238_p2), 0.0   ;;  %v2496_v1 = vmov (!%p238_p2), 0   ;;  %v316_v2 = vld [vmem:[%s3134_s2] sm:$0xff] (!%p238_p2)  ;;  %s2497_s28 = smov (!%p238_p2), 17   ;;  %vm328_vm0 = vcmask (!%p238_p2), 1043456   ;;  %v283_v14 = vlaneseq (!%p238_p2) }
   0x6   : > { %241 = sbr.rel (%p238_p2) target bundleno = 2413 (0x96d), region = 48  ;;  %397 = vmatprep.mubr.f32.mxu0 (!%p238_p2), %v2495_v0  ;;  %2275 = vset.pattern.permute.xlu0 (!%p238_p2), %v2496_v1  ;;  %s2498_s10 = smov (!%p238_p2), 16   ;;  %v314_v5 = vld [vmem:[%s3133_s1] sm:$0xff] (!%p238_p2)  ;;  %vm324_vm1 = vcmask (!%p238_p2), 31744   ;;  %vm420_vm2 = vcmask (!%p238_p2), 138240   ;;  %vm3143_vm4 = vcmask (!%p238_p2), 130048  }
   0x7   : > { %319 = vperm.xlu0 (!%p238_p2), %2275, %v316_v2   ;;  %414 = vrot.lane.b32.xlu1 (!%p238_p2), %v2495_v0, %s2497_s28  ;;  %s2499_s13 = smov (!%p238_p2), 15   ;;  %s2500_s14 = smov (!%p238_p2), 1   ;;  %v405_v13 = vld [vmem:[%s3136_s4] sm:$0xff] (!%p238_p2)  ;;  %v284_v17 = vand.u32 (!%p238_p2), 127, %v283_v14  ;;  %vm3141_vm6 = vcmask (!%p238_p2), 121856   ;;  %vm3142_vm7 = vcmask (!%p238_p2), 7168  }
   0x8   : > { %667 = vmatprep.mubr.f32.mxu1 (!%p238_p2), %v2495_v0  ;;  %s2501_s15 = smov (!%p238_p2), 113   ;;  %s2502_s16 = smov (!%p238_p2), 127   ;;  %vm2505_vm8 = vmmov (!%p238_p2), 1   ;;  %vm506_vm15 = vcmask (!%p238_p2), 1039360  }
   0x9   : > { %s2503_s17 = smov (!%p238_p2), 112   ;;  %s2504_s18 = smov (!%p238_p2), 111   ;;  %v285_v18 = vadd.s32 (!%p238_p2), 128, %v284_v17  ;;  %v290_v22 = vand.u32 (!%p238_p2), 15, %v284_v17 }
   0xb   : > { %435 = vrot.lane.b32.xlu0 (!%p238_p2), %v2495_v0, %s2498_s10  ;;  %454 = vrot.lane.b32.xlu1 (!%p238_p2), %v2495_v0, %s2499_s13  ;;  %v297_v21 = vand.u32 (!%p238_p2), 15, %v285_v18  ;;  %vm2619_vm5 = vcmp.ne.s32.totalorder (!%p238_p2), %v290_v22, 0  ;;  %vm2645_vm12 = vcmp.ne.s32.totalorder (!%p238_p2), %v290_v22, 15 }
   0xc   : > { %vm2637_vm10 = vmpackc.low (!%p238_p2), %vm2505_vm8, %vm2619_vm5 }
   0xd   : > { %s3202_s25 = smov (!%p269_p3, %s2018_s25), 1  ;;  %vm2615_vm3 = vcmp.ne.s32.totalorder %v297_v21, 0  ;;  %vm2641_vm11 = vcmp.ne.s32.totalorder %v297_v21, 15  ;;  %vm2669_vm14 = vmpackc.low %vm2619_vm5, %vm2645_vm12 }
   0xe   : > { %s2038_s29 = sshll.u32 %s3202_s25, 3  ;;  %vm2628_vm9 = vmpackc.low %vm2505_vm8, %vm2615_vm3 }
   0xf   : > { %s273_s9 = scalar_lea.vmem %s3132_s0, %s2038_s29  ;;  %475 = vrot.lane.b32.xlu0 %v2495_v0, %s2500_s14  ;;  %vm2661_vm13 = vmpackc.low %vm2615_vm3, %vm2641_vm11  ;;  %vm3140_vm3 = vcmask 924672  }
  0x10   : > { %v315_v3 = vld [vmem:[%s273_s9] sm:$0xff]  ;;  %vm2691_vm5 = vmpackc.low %vm2645_vm12, %vm2505_vm8 }
  0x11   : > { %v323_v4 = vcombine.high %v315_v3, %v315_v3 }
  0x13   : > { %2027 = vmatprep.subr.msk.mxu0 %vm328_vm0, %v323_v4 }
  0x14   : > { %2028 = vmatpush1.msk.msra.mxu0 %vm328_vm0, %v315_v3  ;;  %vm2682_vm0 = vmpackc.low %vm2641_vm11, %vm2505_vm8  ;;  %vm567_vm8 = vcmask 908288  }
  0x15   : > { %2029 = vmatmul.mubr.msk.f32.vlgmr.msra.gmra.mrb[0].mxu0 %vm324_vm1, %v314_v5  ;;  %vm548_vm1 = vcmask 916480  }
  0x16   : > { %922 = vmatprep.mubr.f32.mxu0 %v2495_v0 }
  0x79   : > { %v415_v15 = vpop.permute.xlu1 %414 }
  0x7d   : > { %v455_v19 = vpop.permute.xlu1 %454 }
  0x86   : > { %v320_v6 = vpop.permute.xlu0 %319 }
  0x8a   : > { %v436_v16 = vpop.permute.xlu0 %435 }
  0x8e   : > { %v476_v20 = vpop.permute.xlu0 %475 }
  0xe8   : > { %v399_v7 = vpop.f32.mrb[0].mxu0 }
  0xe9   : > { %v2577_v8 = vadd.f32 %v399_v7, %v320_v6  ;;  %v401_v9 = vpop.f32.mrb[1].mxu0 }
  0xea   : > { %v2579_v10 = vadd.f32 %v401_v9, %v320_v6 }
  0xec   : > { %v2281_v11 = vpack.i.bf16 %v2579_v10, %v2577_v8  ;;  %v2296_v12 = vpack.i.bf16 %v2495_v0, %v2579_v10 }
  0xee   : > { %2282 = vrot.lane.b32.xlu1 %v2281_v11, %s2498_s10  ;;  %2277 = vrot.lane.b32.xlu0 %v2281_v11, %s2497_s28 }
  0xf2   : > { %2287 = vrot.lane.b32.xlu1 %v2281_v11, %s2499_s13  ;;  %2292 = vrot.lane.b32.xlu0 %v2281_v11, %s2500_s14 }
  0xf6   : > { %521 = vrot.lane.b32.xlu1 %v2577_v8, %s2501_s15  ;;  %500 = vrot.lane.b32.xlu0 %v2577_v8, %s2502_s16 }
  0xfa   : > { %2297 = vrot.lane.b32.xlu1 %v2296_v12, %s2502_s16  ;;  %2307 = vrot.lane.b32.xlu0 %v2296_v12, %s2503_s17 }
  0xfe   : > { %2302 = vrot.lane.b32.xlu1 %v2296_v12, %s2501_s15  ;;  %542 = vrot.lane.b32.xlu0 %v2577_v8, %s2503_s17 }
 0x102   : > { %563 = vrot.lane.b32.xlu1 %v2579_v10, %s2504_s18  ;;  %565 = vrot.lane.b32.xlu0 %v2495_v0, %s2504_s18 }
 0x106   : > { %561 = vrot.lane.b32.xlu1 %v2577_v8, %s2504_s18  ;;  %596 = vperm.xlu0 %2275, %v405_v13  }
 0x10a   : > { %686 = vrot.lane.b32.xlu1 %v2495_v0, %s2497_s28  ;;  %706 = vrot.lane.b32.xlu0 %v2495_v0, %s2498_s10 }
 0x10e   : > { %724 = vrot.lane.b32.xlu1 %v2495_v0, %s2499_s13  ;;  %744 = vrot.lane.b32.xlu0 %v2495_v0, %s2500_s14 }
 0x160   : > { %v2283_v23 = vpop.permute.xlu1 %2282  ;;  %v2278_v24 = vpop.permute.xlu0 %2277 }
 0x161   : > { %v2285_v27 = vunpack.i.h.bf16 %v2283_v23  ;;  %v2284_v28 = vunpack.i.l.bf16 %v2283_v23  ;;  %v2280_v29 = vunpack.i.h.bf16 %v2278_v24  ;;  %v2279_v30 = vunpack.i.l.bf16 %v2278_v24  ;;  %v2714_v23 = vld [vmem:[%s3135_s3] sm:$0xff] }
 0x163   : > { %v422_v31 = vsel %vm420_vm2, %v2279_v30, %v2280_v29  ;;  %v443_v32 = vsel %vm3143_vm4, %v2284_v28, %v2285_v27  ;;  %v421_v34 = vsel %vm420_vm2, %v415_v15, %v2279_v30  ;;  %v442_v35 = vsel %vm3143_vm4, %v436_v16, %v2284_v28 }
 0x164   : > { %v2288_v36 = vpop.permute.xlu1 %2287  ;;  %v2293_v37 = vpop.permute.xlu0 %2292  ;;  %v2112_v38 = vpack.c.bf16 %v443_v32, %v422_v31  ;;  %v2115_v39 = vpack.c.bf16 %v442_v35, %v421_v34 }
 0x165   : > { %v2290_v43 = vunpack.i.h.bf16 %v2288_v36  ;;  %v2289_v44 = vunpack.i.l.bf16 %v2288_v36  ;;  %v2295_v45 = vunpack.i.h.bf16 %v2293_v37  ;;  %v2294_v46 = vunpack.i.l.bf16 %v2293_v37 }
 0x166   : > { %2114 = vmatprep.subr.msk.bf16.mxu1 %vm2628_vm9, %v2112_v38 }
 0x167   : > { %v461_v47 = vsel %vm3141_vm6, %v455_v19, %v2289_v44  ;;  %v462_v48 = vsel %vm3141_vm6, %v2289_v44, %v2290_v43  ;;  %v482_v49 = vsel %vm3142_vm7, %v476_v20, %v2294_v46  ;;  %v483_v50 = vsel %vm3142_vm7, %v2294_v46, %v2295_v45  ;;  %2117 = vmatpush1.bf16.msk.msra.mxu1 %vm2637_vm10, %v2115_v39 }
 0x168   : > { %v2118_v52 = vpack.c.bf16 %v483_v50, %v462_v48  ;;  %v2121_v53 = vpack.c.bf16 %v482_v49, %v461_v47  ;;  %v522_v54 = vpop.permute.xlu1 %521  ;;  %v501_v55 = vpop.permute.xlu0 %500 }
 0x16a   : > { %2120 = vmatprep.subr.msk.bf16.mxu1 %vm2661_vm13, %v2118_v52 }
 0x16b   : > { %2123 = vmatpush1.bf16.msk.msra.mxu1 %vm2669_vm14, %v2121_v53 }
 0x16c   : > { %v2298_v57 = vpop.permute.xlu1 %2297  ;;  %v2308_v58 = vpop.permute.xlu0 %2307 }
 0x16d   : > { %v2300_v59 = vunpack.i.h.bf16 %v2298_v57  ;;  %v2299_v60 = vunpack.i.l.bf16 %v2298_v57  ;;  %v2310_v63 = vunpack.i.h.bf16 %v2308_v58  ;;  %v2309_v1 = vunpack.i.l.bf16 %v2308_v58 }
 0x16f   : > { %v507_v61 = vsel %vm506_vm15, %v501_v55, %v2299_v60  ;;  %v508_v62 = vsel %vm506_vm15, %v2299_v60, %v2300_v59  ;;  %v550_v12 = vsel %vm548_vm1, %v2309_v1, %v2310_v63 }
 0x170   : > { %v2124_v3 = vpack.c.bf16 %v508_v62, %v2579_v10  ;;  %v2127_v4 = vpack.c.bf16 %v507_v61, %v2577_v8  ;;  %v2303_v5 = vpop.permute.xlu1 %2302  ;;  %v543_v6 = vpop.permute.xlu0 %542 }
 0x171   : > { %v2305_v9 = vunpack.i.h.bf16 %v2303_v5  ;;  %v2304_v11 = vunpack.i.l.bf16 %v2303_v5  ;;  %v549_v15 = vsel %vm548_vm1, %v543_v6, %v2309_v1 }
 0x172   : > { %2126 = vmatprep.subr.msk.bf16.mxu1 %vm2682_vm0, %v2124_v3 }
 0x173   : > { %v529_v13 = vsel %vm3140_vm3, %v2304_v11, %v2305_v9  ;;  %v528_v14 = vsel %vm3140_vm3, %v522_v54, %v2304_v11  ;;  %2129 = vmatpush1.bf16.msk.msra.mxu1 %vm2691_vm5, %v2127_v4  ;;  %vm3144_vm3 = vcmask 588800  }
 0x174   : > { %v2130_v16 = vpack.c.bf16 %v550_v12, %v529_v13  ;;  %v2133_v17 = vpack.c.bf16 %v549_v15, %v528_v14  ;;  %v564_v18 = vpop.permute.xlu1 %563  ;;  %v566_v19 = vpop.permute.xlu0 %565 }
 0x175   : > { %v569_v20 = vsel %vm567_vm8, %v564_v18, %v566_v19 }
 0x176   : > { %2132 = vmatprep.subr.msk.bf16.mxu1 %vm2628_vm9, %v2130_v16 }
 0x177   : > { %2135 = vmatpush1.bf16.msk.msra.mxu1 %vm2637_vm10, %v2133_v17 }
 0x178   : > { %v562_v21 = vpop.permute.xlu1 %561  ;;  %2050 = vmatprep.subr.msk.mxu1 %vm2641_vm11, %v569_v20 }
 0x179   : > { %v568_v22 = vsel %vm567_vm8, %v562_v21, %v564_v18 }
 0x17b   : > { %2051 = vmatpush1.msk.msra.mxu1 %vm2645_vm12, %v568_v22 }
 0x17c   : > { %2030 = vmatmul.mubr.msk.f32.vlgmr.msra.gmra.mrb[0].mxu1 %vm3144_vm3, %v2714_v23  ;;  %v687_v36 = vpop.permute.xlu1 %686 }
 0x17d   : > { %1177 = vmatprep.mubr.f32.mxu1 %v2495_v0 }
 0x180   : > { %v725_v38 = vpop.permute.xlu1 %724 }
 0x185   : > { %v2721_v24 = vpop.permute.xlu0 %596 }
 0x189   : > { %v707_v37 = vpop.permute.xlu0 %706 }
 0x18d   : > { %v745_v39 = vpop.permute.xlu0 %744 }
 0x24f   : > { %v669_v25 = vpop.f32.mrb[0].mxu1 }
 0x250   : > { %v670_v26 = vadd.f32 %v669_v25, %v2721_v24  ;;  %v671_v27 = vpop.f32.mrb[1].mxu1 }
 0x251   : > { %v672_v28 = vadd.f32 %v671_v27, %v2721_v24 }
 0x252   : > { %v674_v29 = vmax.f32 %v670_v26, 0.0 }
 0x253   : > { %v675_v30 = vmax.f32 %v672_v28, 0.0 }
 0x254   : > { %v2726_v31 = vadd.f32 %v674_v29, %v2577_v8 }
 0x255   : > { %v2729_v32 = vadd.f32 %v675_v30, %v2579_v10 }
 0x257   : > { %v2316_v34 = vpack.i.bf16 %v2729_v32, %v2726_v31  ;;  %v2341_v35 = vpack.i.bf16 %v2495_v0, %v2729_v32 }
 0x259   : > { %2317 = vrot.lane.b32.xlu0 %v2316_v34, %s2498_s10  ;;  %2312 = vrot.lane.b32.xlu1 %v2316_v34, %s2497_s28 }
 0x25d   : > { %2327 = vrot.lane.b32.xlu0 %v2316_v34, %s2500_s14  ;;  %2322 = vrot.lane.b32.xlu1 %v2316_v34, %s2499_s13 }
 0x261   : > { %768 = vrot.lane.b32.xlu0 %v2726_v31, %s2502_s16  ;;  %788 = vrot.lane.b32.xlu1 %v2726_v31, %s2501_s15 }
 0x265   : > { %2342 = vrot.lane.b32.xlu0 %v2341_v35, %s2503_s17  ;;  %2332 = vrot.lane.b32.xlu1 %v2341_v35, %s2502_s16 }
 0x269   : > { %808 = vrot.lane.b32.xlu0 %v2726_v31, %s2503_s17  ;;  %2337 = vrot.lane.b32.xlu1 %v2341_v35, %s2501_s15 }
 0x26d   : > { %830 = vrot.lane.b32.xlu0 %v2495_v0, %s2504_s18  ;;  %828 = vrot.lane.b32.xlu1 %v2729_v32, %s2504_s18 }
 0x271   : > { %826 = vrot.lane.b32.xlu1 %v2726_v31, %s2504_s18  ;;  %941 = vrot.lane.b32.xlu0 %v2495_v0, %s2497_s28 }
 0x275   : > { %961 = vrot.lane.b32.xlu1 %v2495_v0, %s2498_s10  ;;  %979 = vrot.lane.b32.xlu0 %v2495_v0, %s2499_s13 }
 0x279   : > { %999 = vrot.lane.b32.xlu1 %v2495_v0, %s2500_s14 }
 0x2cb   : > { %v2318_v43 = vpop.permute.xlu0 %2317  ;;  %v2313_v44 = vpop.permute.xlu1 %2312 }
 0x2cc   : > { %v2320_v45 = vunpack.i.h.bf16 %v2318_v43  ;;  %v2319_v46 = vunpack.i.l.bf16 %v2318_v43  ;;  %v2315_v47 = vunpack.i.h.bf16 %v2313_v44  ;;  %v2314_v48 = vunpack.i.l.bf16 %v2313_v44 }
 0x2ce   : > { %v712_v49 = vsel %vm3143_vm4, %v707_v37, %v2319_v46  ;;  %v713_v50 = vsel %vm3143_vm4, %v2319_v46, %v2320_v45  ;;  %v692_v52 = vsel %vm420_vm2, %v687_v36, %v2314_v48  ;;  %v693_v53 = vsel %vm420_vm2, %v2314_v48, %v2315_v47 }
 0x2cf   : > { %v2136_v54 = vpack.c.bf16 %v713_v50, %v693_v53  ;;  %v2139_v55 = vpack.c.bf16 %v712_v49, %v692_v52  ;;  %v2328_v57 = vpop.permute.xlu0 %2327  ;;  %v2323_v58 = vpop.permute.xlu1 %2322 }
 0x2d0   : > { %v2330_v59 = vunpack.i.h.bf16 %v2328_v57  ;;  %v2329_v60 = vunpack.i.l.bf16 %v2328_v57  ;;  %v2325_v61 = vunpack.i.h.bf16 %v2323_v58  ;;  %v2324_v62 = vunpack.i.l.bf16 %v2323_v58 }
 0x2d1   : > { %2138 = vmatprep.subr.msk.bf16.mxu0 %vm2628_vm9, %v2136_v54 }
 0x2d2   : > { %v750_v63 = vsel %vm3142_vm7, %v745_v39, %v2329_v60  ;;  %v751_v1 = vsel %vm3142_vm7, %v2329_v60, %v2330_v59  ;;  %v730_v3 = vsel %vm3141_vm6, %v725_v38, %v2324_v62  ;;  %v731_v4 = vsel %vm3141_vm6, %v2324_v62, %v2325_v61  ;;  %2141 = vmatpush1.bf16.msk.msra.mxu0 %vm2637_vm10, %v2139_v55 }
 0x2d3   : > { %v2142_v5 = vpack.c.bf16 %v751_v1, %v731_v4  ;;  %v2145_v6 = vpack.c.bf16 %v750_v63, %v730_v3  ;;  %v769_v9 = vpop.permute.xlu0 %768  ;;  %v789_v11 = vpop.permute.xlu1 %788  ;;  %vm3165_vm6 = vcmask 924672  }
 0x2d4   : > { %vm3166_vm7 = vmmov %vm3165_vm6 }
 0x2d5   : > { %2144 = vmatprep.subr.msk.bf16.mxu0 %vm2661_vm13, %v2142_v5 }
 0x2d6   : > { %2147 = vmatpush1.bf16.msk.msra.mxu0 %vm2669_vm14, %v2145_v6 }
 0x2d7   : > { %v2343_v12 = vpop.permute.xlu0 %2342  ;;  %v2333_v13 = vpop.permute.xlu1 %2332 }
 0x2d8   : > { %v2335_v14 = vunpack.i.h.bf16 %v2333_v13  ;;  %v2334_v15 = vunpack.i.l.bf16 %v2333_v13  ;;  %v2345_v16 = vunpack.i.h.bf16 %v2343_v12  ;;  %v2344_v17 = vunpack.i.l.bf16 %v2343_v12 }
 0x2da   : > { %v774_v18 = vsel %vm506_vm15, %v769_v9, %v2334_v15  ;;  %v775_v19 = vsel %vm506_vm15, %v2334_v15, %v2335_v14  ;;  %v815_v28 = vsel %vm548_vm1, %v2344_v17, %v2345_v16 }
 0x2db   : > { %v2148_v20 = vpack.c.bf16 %v775_v19, %v2729_v32  ;;  %v2151_v21 = vpack.c.bf16 %v774_v18, %v2726_v31  ;;  %v809_v22 = vpop.permute.xlu0 %808  ;;  %v2338_v25 = vpop.permute.xlu1 %2337 }
 0x2dc   : > { %v2340_v26 = vunpack.i.h.bf16 %v2338_v25  ;;  %v2339_v27 = vunpack.i.l.bf16 %v2338_v25  ;;  %v814_v29 = vsel %vm548_vm1, %v809_v22, %v2344_v17 }
 0x2dd   : > { %2150 = vmatprep.subr.msk.bf16.mxu0 %vm2682_vm0, %v2148_v20 }
 0x2de   : > { %v794_v30 = vsel %vm3165_vm6, %v789_v11, %v2339_v27  ;;  %v795_v34 = vsel %vm3166_vm7, %v2339_v27, %v2340_v26  ;;  %2153 = vmatpush1.bf16.msk.msra.mxu0 %vm2691_vm5, %v2151_v21  ;;  %vm3167_vm6 = vcmask 7168  }
 0x2df   : > { %v2154_v32 = vpack.c.bf16 %v815_v28, %v795_v34  ;;  %v2157_v31 = vpack.c.bf16 %v814_v29, %v794_v30  ;;  %v831_v35 = vpop.permute.xlu0 %830  ;;  %v829_v36 = vpop.permute.xlu1 %828  ;;  %vm3168_vm7 = vmmov %vm3167_vm6 }
 0x2e0   : > { %v833_v37 = vsel %vm567_vm8, %v829_v36, %v831_v35 }
 0x2e1   : > { %2156 = vmatprep.subr.msk.bf16.mxu0 %vm2628_vm9, %v2154_v32 }
 0x2e2   : > { %2159 = vmatpush1.bf16.msk.msra.mxu0 %vm2637_vm10, %v2157_v31 }
 0x2e3   : > { %v827_v38 = vpop.permute.xlu1 %826  ;;  %2062 = vmatprep.subr.msk.mxu0 %vm2641_vm11, %v833_v37  ;;  %v942_v54 = vpop.permute.xlu0 %941 }
 0x2e4   : > { %v832_v39 = vsel %vm567_vm8, %v827_v38, %v829_v36 }
 0x2e6   : > { %2063 = vmatpush1.msk.msra.mxu0 %vm2645_vm12, %v832_v39 }
 0x2e7   : > { %2031 = vmatmul.mubr.msk.f32.vlgmr.msra.gmra.mrb[2].mxu0 %vm3144_vm3, %v2714_v23  ;;  %v962_v55 = vpop.permute.xlu1 %961  ;;  %v980_v57 = vpop.permute.xlu0 %979 }
 0x2e8   : > { %1440 = vmatprep.mubr.f32.mxu0 %v2495_v0 }
 0x2eb   : > { %v1000_v58 = vpop.permute.xlu1 %999 }
 0x3ba   : > { %v924_v43 = vpop.f32.mrb[2].mxu0 }
 0x3bb   : > { %v925_v44 = vadd.f32 %v924_v43, %v2721_v24  ;;  %v926_v45 = vpop.f32.mrb[3].mxu0 }
 0x3bc   : > { %v927_v46 = vadd.f32 %v926_v45, %v2721_v24 }
 0x3bd   : > { %v929_v47 = vmax.f32 %v925_v44, 0.0 }
 0x3be   : > { %v930_v48 = vmax.f32 %v927_v46, 0.0 }
 0x3bf   : > { %v2806_v49 = vadd.f32 %v929_v47, %v2577_v8 }
 0x3c0   : > { %v2809_v50 = vadd.f32 %v930_v48, %v2579_v10 }
 0x3c2   : > { %v2351_v52 = vpack.i.bf16 %v2809_v50, %v2806_v49  ;;  %v2376_v53 = vpack.i.bf16 %v2495_v0, %v2809_v50 }
 0x3c4   : > { %2352 = vrot.lane.b32.xlu1 %v2351_v52, %s2498_s10  ;;  %2347 = vrot.lane.b32.xlu0 %v2351_v52, %s2497_s28 }
 0x3c8   : > { %2362 = vrot.lane.b32.xlu1 %v2351_v52, %s2500_s14  ;;  %2357 = vrot.lane.b32.xlu0 %v2351_v52, %s2499_s13 }
 0x3cc   : > { %1023 = vrot.lane.b32.xlu1 %v2806_v49, %s2502_s16  ;;  %1043 = vrot.lane.b32.xlu0 %v2806_v49, %s2501_s15 }
 0x3d0   : > { %2377 = vrot.lane.b32.xlu1 %v2376_v53, %s2503_s17  ;;  %2367 = vrot.lane.b32.xlu0 %v2376_v53, %s2502_s16 }
 0x3d4   : > { %1063 = vrot.lane.b32.xlu1 %v2806_v49, %s2503_s17  ;;  %2372 = vrot.lane.b32.xlu0 %v2376_v53, %s2501_s15 }
 0x3d8   : > { %1085 = vrot.lane.b32.xlu1 %v2495_v0, %s2504_s18  ;;  %1083 = vrot.lane.b32.xlu0 %v2809_v50, %s2504_s18 }
 0x3dc   : > { %1081 = vrot.lane.b32.xlu0 %v2806_v49, %s2504_s18  ;;  %1196 = vrot.lane.b32.xlu1 %v2495_v0, %s2497_s28 }
 0x3e0   : > { %1216 = vrot.lane.b32.xlu0 %v2495_v0, %s2498_s10  ;;  %1234 = vrot.lane.b32.xlu1 %v2495_v0, %s2499_s13 }
 0x3e4   : > { %1254 = vrot.lane.b32.xlu0 %v2495_v0, %s2500_s14 }
 0x436   : > { %v2353_v59 = vpop.permute.xlu1 %2352  ;;  %v2348_v60 = vpop.permute.xlu0 %2347 }
 0x437   : > { %v2355_v61 = vunpack.i.h.bf16 %v2353_v59  ;;  %v2354_v62 = vunpack.i.l.bf16 %v2353_v59  ;;  %v2350_v63 = vunpack.i.h.bf16 %v2348_v60  ;;  %v2349_v1 = vunpack.i.l.bf16 %v2348_v60 }
 0x439   : > { %v967_v3 = vsel %vm3143_vm4, %v962_v55, %v2354_v62  ;;  %v968_v4 = vsel %vm3143_vm4, %v2354_v62, %v2355_v61  ;;  %v947_v5 = vsel %vm420_vm2, %v942_v54, %v2349_v1  ;;  %v948_v6 = vsel %vm420_vm2, %v2349_v1, %v2350_v63 }
 0x43a   : > { %v2160_v9 = vpack.c.bf16 %v968_v4, %v948_v6  ;;  %v2163_v11 = vpack.c.bf16 %v967_v3, %v947_v5  ;;  %v2363_v12 = vpop.permute.xlu1 %2362  ;;  %v2358_v13 = vpop.permute.xlu0 %2357  ;;  %vm3169_vm4 = vcmask 121856  }
 0x43b   : > { %v2365_v14 = vunpack.i.h.bf16 %v2363_v12  ;;  %v2364_v15 = vunpack.i.l.bf16 %v2363_v12  ;;  %v2360_v16 = vunpack.i.h.bf16 %v2358_v13  ;;  %v2359_v17 = vunpack.i.l.bf16 %v2358_v13  ;;  %vm3170_vm3 = vmmov %vm3169_vm4 }
 0x43c   : > { %2162 = vmatprep.subr.msk.bf16.mxu1 %vm2628_vm9, %v2160_v9 }
 0x43d   : > { %v1005_v18 = vsel %vm3167_vm6, %v1000_v58, %v2364_v15  ;;  %v1006_v19 = vsel %vm3168_vm7, %v2364_v15, %v2365_v14  ;;  %v985_v20 = vsel %vm3169_vm4, %v980_v57, %v2359_v17  ;;  %v986_v21 = vsel %vm3170_vm3, %v2359_v17, %v2360_v16  ;;  %2165 = vmatpush1.bf16.msk.msra.mxu1 %vm2637_vm10, %v2163_v11 }
 0x43e   : > { %v2166_v22 = vpack.c.bf16 %v1006_v19, %v986_v21  ;;  %v2169_v25 = vpack.c.bf16 %v1005_v18, %v985_v20  ;;  %v1024_v26 = vpop.permute.xlu1 %1023  ;;  %v1044_v27 = vpop.permute.xlu0 %1043  ;;  %vm3171_vm4 = vcmask 924672   ;;  %vm3173_vm6 = vcmask 588800  }
 0x43f   : > { %vm3172_vm3 = vmmov %vm3171_vm4  ;;  %vm3174_vm7 = vcmask 130048  }
 0x440   : > { %2168 = vmatprep.subr.msk.bf16.mxu1 %vm2661_vm13, %v2166_v22 }
 0x441   : > { %2171 = vmatpush1.bf16.msk.msra.mxu1 %vm2669_vm14, %v2169_v25 }
 0x442   : > { %v2378_v28 = vpop.permute.xlu1 %2377  ;;  %v2368_v29 = vpop.permute.xlu0 %2367 }
 0x443   : > { %v2370_v30 = vunpack.i.h.bf16 %v2368_v29  ;;  %v2369_v34 = vunpack.i.l.bf16 %v2368_v29  ;;  %v2380_v32 = vunpack.i.h.bf16 %v2378_v28  ;;  %v2379_v31 = vunpack.i.l.bf16 %v2378_v28 }
 0x445   : > { %v1029_v35 = vsel %vm506_vm15, %v1024_v26, %v2369_v34  ;;  %v1030_v36 = vsel %vm506_vm15, %v2369_v34, %v2370_v30  ;;  %v1070_v46 = vsel %vm548_vm1, %v2379_v31, %v2380_v32 }
 0x446   : > { %v2172_v37 = vpack.c.bf16 %v1030_v36, %v2809_v50  ;;  %v2175_v38 = vpack.c.bf16 %v1029_v35, %v2806_v49  ;;  %v1064_v39 = vpop.permute.xlu1 %1063  ;;  %v2373_v43 = vpop.permute.xlu0 %2372 }
 0x447   : > { %v2375_v44 = vunpack.i.h.bf16 %v2373_v43  ;;  %v2374_v45 = vunpack.i.l.bf16 %v2373_v43  ;;  %v1069_v47 = vsel %vm548_vm1, %v1064_v39, %v2379_v31 }
 0x448   : > { %2174 = vmatprep.subr.msk.bf16.mxu1 %vm2682_vm0, %v2172_v37 }
 0x449   : > { %v1049_v48 = vsel %vm3171_vm4, %v1044_v27, %v2374_v45  ;;  %v1050_v52 = vsel %vm3172_vm3, %v2374_v45, %v2375_v44  ;;  %2177 = vmatpush1.bf16.msk.msra.mxu1 %vm2691_vm5, %v2175_v38  ;;  %vm3175_vm4 = vmmov %vm3174_vm7  ;;  %vm3176_vm3 = vcmask 7168  }
 0x44a   : > { %v2178_v50 = vpack.c.bf16 %v1070_v46, %v1050_v52  ;;  %v2181_v49 = vpack.c.bf16 %v1069_v47, %v1049_v48  ;;  %v1086_v53 = vpop.permute.xlu1 %1085  ;;  %v1084_v54 = vpop.permute.xlu0 %1083 }
 0x44b   : > { %v1088_v55 = vsel %vm567_vm8, %v1084_v54, %v1086_v53 }
 0x44c   : > { %2180 = vmatprep.subr.msk.bf16.mxu1 %vm2628_vm9, %v2178_v50 }
 0x44d   : > { %2183 = vmatpush1.bf16.msk.msra.mxu1 %vm2637_vm10, %v2181_v49 }
 0x44e   : > { %v1082_v57 = vpop.permute.xlu0 %1081  ;;  %2074 = vmatprep.subr.msk.mxu1 %vm2641_vm11, %v1088_v55  ;;  %v1197_v4 = vpop.permute.xlu1 %1196 }
 0x44f   : > { %v1087_v58 = vsel %vm567_vm8, %v1082_v57, %v1084_v54 }
 0x451   : > { %2075 = vmatpush1.msk.msra.mxu1 %vm2645_vm12, %v1087_v58 }
 0x452   : > { %2032 = vmatmul.mubr.msk.f32.vlgmr.msra.gmra.mrb[2].mxu1 %vm3173_vm6, %v2714_v23  ;;  %v1217_v5 = vpop.permute.xlu0 %1216  ;;  %v1235_v6 = vpop.permute.xlu1 %1234  ;;  %vm3177_vm6 = vmmov %vm3176_vm3 }
 0x453   : > { %1695 = vmatprep.mubr.f32.mxu1 %v2495_v0 }
 0x456   : > { %v1255_v9 = vpop.permute.xlu0 %1254 }
 0x525   : > { %v1179_v59 = vpop.f32.mrb[2].mxu1 }
 0x526   : > { %v1180_v60 = vadd.f32 %v1179_v59, %v2721_v24  ;;  %v1181_v61 = vpop.f32.mrb[3].mxu1 }
 0x527   : > { %v1182_v62 = vadd.f32 %v1181_v61, %v2721_v24  ;;  %v1187_v24 = vld [vmem:[%s3138_s6] sm:$0xff] }
 0x528   : > { %v2885_v63 = vmax.f32 %v1180_v60, 0.0 }
 0x529   : > { %v2887_v1 = vmax.f32 %v1182_v62, 0.0 }
 0x52b   : > { %v2386_v3 = vpack.i.bf16 %v2887_v1, %v2885_v63  ;;  %v2411_v23 = vpack.i.bf16 %v2495_v0, %v2887_v1 }
 0x52d   : > { %2387 = vrot.lane.b32.xlu0 %v2386_v3, %s2498_s10  ;;  %2382 = vrot.lane.b32.xlu1 %v2386_v3, %s2497_s28 }
 0x531   : > { %2397 = vrot.lane.b32.xlu0 %v2386_v3, %s2500_s14  ;;  %2392 = vrot.lane.b32.xlu1 %v2386_v3, %s2499_s13 }
 0x535   : > { %1278 = vrot.lane.b32.xlu0 %v2885_v63, %s2502_s16  ;;  %1298 = vrot.lane.b32.xlu1 %v2885_v63, %s2501_s15 }
 0x539   : > { %2412 = vrot.lane.b32.xlu0 %v2411_v23, %s2503_s17  ;;  %2402 = vrot.lane.b32.xlu1 %v2411_v23, %s2502_s16 }
 0x53d   : > { %1318 = vrot.lane.b32.xlu0 %v2885_v63, %s2503_s17  ;;  %2407 = vrot.lane.b32.xlu1 %v2411_v23, %s2501_s15 }
 0x541   : > { %1340 = vrot.lane.b32.xlu0 %v2495_v0, %s2504_s18  ;;  %1338 = vrot.lane.b32.xlu1 %v2887_v1, %s2504_s18 }
 0x545   : > { %1370 = vperm.xlu0 %2275, %v1187_v24   ;;  %1336 = vrot.lane.b32.xlu1 %v2885_v63, %s2504_s18 }
 0x549   : > { %1479 = vrot.lane.b32.xlu0 %v2495_v0, %s2498_s10  ;;  %1459 = vrot.lane.b32.xlu1 %v2495_v0, %s2497_s28 }
 0x54d   : > { %1517 = vrot.lane.b32.xlu0 %v2495_v0, %s2500_s14  ;;  %1497 = vrot.lane.b32.xlu1 %v2495_v0, %s2499_s13 }
 0x59f   : > { %v2388_v11 = vpop.permute.xlu0 %2387  ;;  %v2383_v12 = vpop.permute.xlu1 %2382 }
 0x5a0   : > { %v2390_v13 = vunpack.i.h.bf16 %v2388_v11  ;;  %v2389_v14 = vunpack.i.l.bf16 %v2388_v11  ;;  %v2385_v15 = vunpack.i.h.bf16 %v2383_v12  ;;  %v2384_v16 = vunpack.i.l.bf16 %v2383_v12  ;;  %v2962_v11 = vld [vmem:[%s3137_s5] sm:$0xff] }
 0x5a2   : > { %v1222_v17 = vsel %vm3174_vm7, %v1217_v5, %v2389_v14  ;;  %v1223_v18 = vsel %vm3175_vm4, %v2389_v14, %v2390_v13  ;;  %v1202_v19 = vsel %vm420_vm2, %v1197_v4, %v2384_v16  ;;  %v1203_v20 = vsel %vm420_vm2, %v2384_v16, %v2385_v15 }
 0x5a3   : > { %v2184_v21 = vpack.c.bf16 %v1223_v18, %v1203_v20  ;;  %v2187_v22 = vpack.c.bf16 %v1222_v17, %v1202_v19  ;;  %v2398_v25 = vpop.permute.xlu0 %2397  ;;  %v2393_v26 = vpop.permute.xlu1 %2392  ;;  %vm3178_vm7 = vcmask 121856  }
 0x5a4   : > { %v2400_v27 = vunpack.i.h.bf16 %v2398_v25  ;;  %v2399_v28 = vunpack.i.l.bf16 %v2398_v25  ;;  %v2395_v29 = vunpack.i.h.bf16 %v2393_v26  ;;  %v2394_v30 = vunpack.i.l.bf16 %v2393_v26  ;;  %vm3179_vm4 = vmmov %vm3178_vm7 }
 0x5a5   : > { %2186 = vmatprep.subr.msk.bf16.mxu0 %vm2628_vm9, %v2184_v21 }
 0x5a6   : > { %v1260_v34 = vsel %vm3176_vm3, %v1255_v9, %v2399_v28  ;;  %v1261_v32 = vsel %vm3177_vm6, %v2399_v28, %v2400_v27  ;;  %v1240_v31 = vsel %vm3178_vm7, %v1235_v6, %v2394_v30  ;;  %v1241_v35 = vsel %vm3179_vm4, %v2394_v30, %v2395_v29  ;;  %2189 = vmatpush1.bf16.msk.msra.mxu0 %vm2637_vm10, %v2187_v22 }
 0x5a7   : > { %v2190_v36 = vpack.c.bf16 %v1261_v32, %v1241_v35  ;;  %v2193_v37 = vpack.c.bf16 %v1260_v34, %v1240_v31  ;;  %v1279_v38 = vpop.permute.xlu0 %1278  ;;  %v1299_v39 = vpop.permute.xlu1 %1298  ;;  %vm3180_vm3 = vcmask 924672   ;;  %vm3182_vm7 = vcmask 588800  }
 0x5a8   : > { %vm3181_vm6 = vmmov %vm3180_vm3  ;;  %vm3183_vm4 = vcmask 130048  }
 0x5a9   : > { %2192 = vmatprep.subr.msk.bf16.mxu0 %vm2661_vm13, %v2190_v36 }
 0x5aa   : > { %2195 = vmatpush1.bf16.msk.msra.mxu0 %vm2669_vm14, %v2193_v37 }
 0x5ab   : > { %v2413_v43 = vpop.permute.xlu0 %2412  ;;  %v2403_v44 = vpop.permute.xlu1 %2402 }
 0x5ac   : > { %v2405_v45 = vunpack.i.h.bf16 %v2403_v44  ;;  %v2404_v46 = vunpack.i.l.bf16 %v2403_v44  ;;  %v2415_v47 = vunpack.i.h.bf16 %v2413_v43  ;;  %v2414_v48 = vunpack.i.l.bf16 %v2413_v43 }
 0x5ae   : > { %v1284_v52 = vsel %vm506_vm15, %v1279_v38, %v2404_v46  ;;  %v1285_v50 = vsel %vm506_vm15, %v2404_v46, %v2405_v45  ;;  %v1325_v59 = vsel %vm548_vm1, %v2414_v48, %v2415_v47 }
 0x5af   : > { %v2196_v49 = vpack.c.bf16 %v1285_v50, %v2887_v1  ;;  %v2199_v53 = vpack.c.bf16 %v1284_v52, %v2885_v63  ;;  %v1319_v54 = vpop.permute.xlu0 %1318  ;;  %v2408_v55 = vpop.permute.xlu1 %2407 }
 0x5b0   : > { %v2410_v57 = vunpack.i.h.bf16 %v2408_v55  ;;  %v2409_v58 = vunpack.i.l.bf16 %v2408_v55  ;;  %v1324_v60 = vsel %vm548_vm1, %v1319_v54, %v2414_v48 }
 0x5b1   : > { %2198 = vmatprep.subr.msk.bf16.mxu0 %vm2682_vm0, %v2196_v49 }
 0x5b2   : > { %v1304_v61 = vsel %vm3180_vm3, %v1299_v39, %v2409_v58  ;;  %v1305_v62 = vsel %vm3181_vm6, %v2409_v58, %v2410_v57  ;;  %2201 = vmatpush1.bf16.msk.msra.mxu0 %vm2691_vm5, %v2199_v53  ;;  %vm3184_vm3 = vmmov %vm3183_vm4  ;;  %vm3185_vm6 = vcmask 7168  }
 0x5b3   : > { %v2202_v3 = vpack.c.bf16 %v1325_v59, %v1305_v62  ;;  %v2205_v23 = vpack.c.bf16 %v1324_v60, %v1304_v61  ;;  %v1341_v24 = vpop.permute.xlu0 %1340  ;;  %v1339_v4 = vpop.permute.xlu1 %1338 }
 0x5b4   : > { %v1343_v5 = vsel %vm567_vm8, %v1339_v4, %v1341_v24 }
 0x5b5   : > { %2204 = vmatprep.subr.msk.bf16.mxu0 %vm2628_vm9, %v2202_v3 }
 0x5b6   : > { %2207 = vmatpush1.bf16.msk.msra.mxu0 %vm2637_vm10, %v2205_v23 }
 0x5b7   : > { %v1337_v6 = vpop.permute.xlu1 %1336  ;;  %2086 = vmatprep.subr.msk.mxu0 %vm2641_vm11, %v1343_v5 }
 0x5b8   : > { %v1342_v9 = vsel %vm567_vm8, %v1337_v6, %v1339_v4 }
 0x5ba   : > { %2087 = vmatpush1.msk.msra.mxu0 %vm2645_vm12, %v1342_v9 }
 0x5bb   : > { %2033 = vmatmul.mubr.msk.f32.vlgmr.msra.gmra.mrb[4].mxu0 %vm3182_vm7, %v2962_v11  ;;  %v1460_v26 = vpop.permute.xlu1 %1459  ;;  %vm3186_vm7 = vmmov %vm3185_vm6 }
 0x5bc   : > { %1950 = vmatprep.mubr.f32.mxu0 %v2495_v0 }
 0x5bf   : > { %v1498_v28 = vpop.permute.xlu1 %1497 }
 0x5c4   : > { %v2969_v12 = vpop.permute.xlu0 %1370 }
 0x5c8   : > { %v1480_v25 = vpop.permute.xlu0 %1479 }
 0x5cc   : > { %v1518_v27 = vpop.permute.xlu0 %1517 }
 0x68e   : > { %v1442_v13 = vpop.f32.mrb[4].mxu0 }
 0x68f   : > { %v1443_v14 = vadd.f32 %v1442_v13, %v2969_v12  ;;  %v1444_v15 = vpop.f32.mrb[5].mxu0 }
 0x690   : > { %v1445_v16 = vadd.f32 %v1444_v15, %v2969_v12 }
 0x691   : > { %v1447_v17 = vmax.f32 %v1443_v14, 0.0 }
 0x692   : > { %v1448_v18 = vmax.f32 %v1445_v16, 0.0 }
 0x693   : > { %v2974_v19 = vadd.f32 %v1447_v17, %v2885_v63 }
 0x694   : > { %v2977_v20 = vadd.f32 %v1448_v18, %v2887_v1 }
 0x696   : > { %v2421_v21 = vpack.i.bf16 %v2977_v20, %v2974_v19  ;;  %v2446_v22 = vpack.i.bf16 %v2495_v0, %v2977_v20 }
 0x698   : > { %2422 = vrot.lane.b32.xlu0 %v2421_v21, %s2498_s10  ;;  %2417 = vrot.lane.b32.xlu1 %v2421_v21, %s2497_s28 }
 0x69c   : > { %2432 = vrot.lane.b32.xlu0 %v2421_v21, %s2500_s14  ;;  %2427 = vrot.lane.b32.xlu1 %v2421_v21, %s2499_s13 }
 0x6a0   : > { %1541 = vrot.lane.b32.xlu0 %v2974_v19, %s2502_s16  ;;  %1561 = vrot.lane.b32.xlu1 %v2974_v19, %s2501_s15 }
 0x6a4   : > { %2447 = vrot.lane.b32.xlu0 %v2446_v22, %s2503_s17  ;;  %2437 = vrot.lane.b32.xlu1 %v2446_v22, %s2502_s16 }
 0x6a8   : > { %1581 = vrot.lane.b32.xlu0 %v2974_v19, %s2503_s17  ;;  %2442 = vrot.lane.b32.xlu1 %v2446_v22, %s2501_s15 }
 0x6ac   : > { %1603 = vrot.lane.b32.xlu0 %v2495_v0, %s2504_s18  ;;  %1601 = vrot.lane.b32.xlu1 %v2977_v20, %s2504_s18 }
 0x6b0   : > { %1599 = vrot.lane.b32.xlu1 %v2974_v19, %s2504_s18  ;;  %1714 = vrot.lane.b32.xlu0 %v2495_v0, %s2497_s28 }
 0x6b4   : > { %1734 = vrot.lane.b32.xlu1 %v2495_v0, %s2498_s10  ;;  %1752 = vrot.lane.b32.xlu0 %v2495_v0, %s2499_s13 }
 0x6b8   : > { %1772 = vrot.lane.b32.xlu1 %v2495_v0, %s2500_s14 }
 0x70a   : > { %v2423_v29 = vpop.permute.xlu0 %2422  ;;  %v2418_v30 = vpop.permute.xlu1 %2417 }
 0x70b   : > { %v2425_v34 = vunpack.i.h.bf16 %v2423_v29  ;;  %v2424_v32 = vunpack.i.l.bf16 %v2423_v29  ;;  %v2420_v31 = vunpack.i.h.bf16 %v2418_v30  ;;  %v2419_v35 = vunpack.i.l.bf16 %v2418_v30 }
 0x70d   : > { %v1485_v36 = vsel %vm3183_vm4, %v1480_v25, %v2424_v32  ;;  %v1486_v37 = vsel %vm3184_vm3, %v2424_v32, %v2425_v34  ;;  %v1465_v38 = vsel %vm420_vm2, %v1460_v26, %v2419_v35  ;;  %v1466_v39 = vsel %vm420_vm2, %v2419_v35, %v2420_v31 }
 0x70e   : > { %v2208_v43 = vpack.c.bf16 %v1486_v37, %v1466_v39  ;;  %v2211_v44 = vpack.c.bf16 %v1485_v36, %v1465_v38  ;;  %v2433_v45 = vpop.permute.xlu0 %2432  ;;  %v2428_v46 = vpop.permute.xlu1 %2427  ;;  %vm3187_vm4 = vcmask 121856  }
 0x70f   : > { %v2435_v47 = vunpack.i.h.bf16 %v2433_v45  ;;  %v2434_v48 = vunpack.i.l.bf16 %v2433_v45  ;;  %v2430_v52 = vunpack.i.h.bf16 %v2428_v46  ;;  %v2429_v50 = vunpack.i.l.bf16 %v2428_v46  ;;  %vm3188_vm3 = vmmov %vm3187_vm4 }
 0x710   : > { %2210 = vmatprep.subr.msk.bf16.mxu1 %vm2628_vm9, %v2208_v43 }
 0x711   : > { %v1523_v49 = vsel %vm3185_vm6, %v1518_v27, %v2434_v48  ;;  %v1524_v53 = vsel %vm3186_vm7, %v2434_v48, %v2435_v47  ;;  %v1503_v54 = vsel %vm3187_vm4, %v1498_v28, %v2429_v50  ;;  %v1504_v55 = vsel %vm3188_vm3, %v2429_v50, %v2430_v52  ;;  %2213 = vmatpush1.bf16.msk.msra.mxu1 %vm2637_vm10, %v2211_v44 }
 0x712   : > { %v2214_v57 = vpack.c.bf16 %v1524_v53, %v1504_v55  ;;  %v2217_v58 = vpack.c.bf16 %v1523_v49, %v1503_v54  ;;  %v1542_v59 = vpop.permute.xlu0 %1541  ;;  %v1562_v60 = vpop.permute.xlu1 %1561  ;;  %vm3189_vm6 = vcmask 924672   ;;  %vm3191_vm4 = vcmask 588800  }
 0x713   : > { %vm3190_vm7 = vmmov %vm3189_vm6  ;;  %vm3192_vm3 = vcmask 130048  }
 0x714   : > { %2216 = vmatprep.subr.msk.bf16.mxu1 %vm2661_vm13, %v2214_v57 }
 0x715   : > { %2219 = vmatpush1.bf16.msk.msra.mxu1 %vm2669_vm14, %v2217_v58 }
 0x716   : > { %v2448_v61 = vpop.permute.xlu0 %2447  ;;  %v2438_v62 = vpop.permute.xlu1 %2437 }
 0x717   : > { %v2440_v3 = vunpack.i.h.bf16 %v2438_v62  ;;  %v2439_v23 = vunpack.i.l.bf16 %v2438_v62  ;;  %v2450_v24 = vunpack.i.h.bf16 %v2448_v61  ;;  %v2449_v4 = vunpack.i.l.bf16 %v2448_v61 }
 0x719   : > { %v1547_v5 = vsel %vm506_vm15, %v1542_v59, %v2439_v23  ;;  %v1548_v6 = vsel %vm506_vm15, %v2439_v23, %v2440_v3  ;;  %v1588_v18 = vsel %vm548_vm1, %v2449_v4, %v2450_v24 }
 0x71a   : > { %v2220_v9 = vpack.c.bf16 %v1548_v6, %v2977_v20  ;;  %v2223_v13 = vpack.c.bf16 %v1547_v5, %v2974_v19  ;;  %v1582_v14 = vpop.permute.xlu0 %1581  ;;  %v2443_v15 = vpop.permute.xlu1 %2442 }
 0x71b   : > { %v2445_v16 = vunpack.i.h.bf16 %v2443_v15  ;;  %v2444_v17 = vunpack.i.l.bf16 %v2443_v15  ;;  %v1587_v21 = vsel %vm548_vm1, %v1582_v14, %v2449_v4 }
 0x71c   : > { %2222 = vmatprep.subr.msk.bf16.mxu1 %vm2682_vm0, %v2220_v9 }
 0x71d   : > { %v1567_v22 = vsel %vm3189_vm6, %v1562_v60, %v2444_v17  ;;  %v1568_v25 = vsel %vm3190_vm7, %v2444_v17, %v2445_v16  ;;  %2225 = vmatpush1.bf16.msk.msra.mxu1 %vm2691_vm5, %v2223_v13  ;;  %vm3193_vm6 = vmmov %vm3192_vm3  ;;  %vm3194_vm7 = vcmask 7168  }
 0x71e   : > { %v2226_v20 = vpack.c.bf16 %v1588_v18, %v1568_v25  ;;  %v2229_v19 = vpack.c.bf16 %v1587_v21, %v1567_v22  ;;  %v1604_v26 = vpop.permute.xlu0 %1603  ;;  %v1602_v27 = vpop.permute.xlu1 %1601 }
 0x71f   : > { %v1606_v28 = vsel %vm567_vm8, %v1602_v27, %v1604_v26 }
 0x720   : > { %2228 = vmatprep.subr.msk.bf16.mxu1 %vm2628_vm9, %v2226_v20 }
 0x721   : > { %2231 = vmatpush1.bf16.msk.msra.mxu1 %vm2637_vm10, %v2229_v19 }
 0x722   : > { %v1600_v29 = vpop.permute.xlu1 %1599  ;;  %2098 = vmatprep.subr.msk.mxu1 %vm2641_vm11, %v1606_v28 }
 0x723   : > { %v1605_v30 = vsel %vm567_vm8, %v1600_v29, %v1602_v27 }
 0x725   : > { %2099 = vmatpush1.msk.msra.mxu1 %vm2645_vm12, %v1605_v30 }
 0x726   : > { %2034 = vmatmul.mubr.msk.f32.vlgmr.msra.gmra.mrb[4].mxu1 %vm3191_vm4, %v2962_v11  ;;  %v1735_v44 = vpop.permute.xlu1 %1734  ;;  %vm3195_vm4 = vmmov %vm3194_vm7 }
 0x72a   : > { %v1773_v46 = vpop.permute.xlu1 %1772 }
 0x7f9   : > { %v1697_v34 = vpop.f32.mrb[4].mxu1 }
 0x7fa   : > { %v1698_v32 = vadd.f32 %v1697_v34, %v2969_v12  ;;  %v1699_v31 = vpop.f32.mrb[5].mxu1 }
 0x7fb   : > { %v1700_v35 = vadd.f32 %v1699_v31, %v2969_v12 }
 0x7fc   : > { %v1702_v36 = vmax.f32 %v1698_v32, 0.0 }
 0x7fd   : > { %v1703_v37 = vmax.f32 %v1700_v35, 0.0 }
 0x7fe   : > { %v3053_v38 = vadd.f32 %v1702_v36, %v2885_v63 }
 0x7ff   : > { %v3056_v39 = vadd.f32 %v1703_v37, %v2887_v1  ;;  %v1715_v1 = vpop.permute.xlu0 %1714 }
 0x801   : > { %v2456_v43 = vpack.i.bf16 %v3056_v39, %v3053_v38  ;;  %v2481_v63 = vpack.i.bf16 %v2495_v0, %v3056_v39 }
 0x803   : > { %2457 = vrot.lane.b32.xlu1 %v2456_v43, %s2498_s10  ;;  %2452 = vrot.lane.b32.xlu0 %v2456_v43, %s2497_s28  ;;  %v1753_v45 = vpop.permute.xlu0 %1752  ;;  %s2039_s28 = sshll.u32 %s3202_s25, 4 }
 0x804   : > { %s278_s9 = scalar_lea.vmem %s3139_s7, %s2039_s28 }
 0x807   : > { %2467 = vrot.lane.b32.xlu1 %v2456_v43, %s2500_s14  ;;  %2462 = vrot.lane.b32.xlu0 %v2456_v43, %s2499_s13 }
 0x80b   : > { %1796 = vrot.lane.b32.xlu1 %v3053_v38, %s2502_s16  ;;  %1816 = vrot.lane.b32.xlu0 %v3053_v38, %s2501_s15 }
 0x80f   : > { %2482 = vrot.lane.b32.xlu1 %v2481_v63, %s2503_s17  ;;  %2472 = vrot.lane.b32.xlu0 %v2481_v63, %s2502_s16 }
 0x813   : > { %1836 = vrot.lane.b32.xlu1 %v3053_v38, %s2503_s17  ;;  %2477 = vrot.lane.b32.xlu0 %v2481_v63, %s2501_s15 }
 0x817   : > { %1858 = vrot.lane.b32.xlu1 %v2495_v0, %s2504_s18  ;;  %1856 = vrot.lane.b32.xlu0 %v3056_v39, %s2504_s18 }
 0x81b   : > { %1854 = vrot.lane.b32.xlu0 %v3053_v38, %s2504_s18 }
 0x875   : > { %v2458_v47 = vpop.permute.xlu1 %2457  ;;  %v2453_v48 = vpop.permute.xlu0 %2452 }
 0x876   : > { %v2460_v52 = vunpack.i.h.bf16 %v2458_v47  ;;  %v2459_v50 = vunpack.i.l.bf16 %v2458_v47  ;;  %v2455_v49 = vunpack.i.h.bf16 %v2453_v48  ;;  %v2454_v53 = vunpack.i.l.bf16 %v2453_v48 }
 0x878   : > { %v1740_v54 = vsel %vm3192_vm3, %v1735_v44, %v2459_v50  ;;  %v1741_v0 = vsel %vm3193_vm6, %v2459_v50, %v2460_v52  ;;  %v1720_v55 = vsel %vm420_vm2, %v1715_v1, %v2454_v53  ;;  %v1721_v57 = vsel %vm420_vm2, %v2454_v53, %v2455_v49 }
 0x879   : > { %v2232_v58 = vpack.c.bf16 %v1741_v0, %v1721_v57  ;;  %v2235_v59 = vpack.c.bf16 %v1740_v54, %v1720_v55  ;;  %v2468_v60 = vpop.permute.xlu1 %2467  ;;  %v2463_v61 = vpop.permute.xlu0 %2462  ;;  %vm3196_vm3 = vcmask 121856   ;;  %vm3198_vm2 = vcmask 924672  }
 0x87a   : > { %v2470_v62 = vunpack.i.h.bf16 %v2468_v60  ;;  %v2469_v3 = vunpack.i.l.bf16 %v2468_v60  ;;  %v2465_v23 = vunpack.i.h.bf16 %v2463_v61  ;;  %v2464_v24 = vunpack.i.l.bf16 %v2463_v61  ;;  %vm3197_vm6 = vmmov %vm3196_vm3 }
 0x87b   : > { %2234 = vmatprep.subr.msk.bf16.mxu0 %vm2628_vm9, %v2232_v58 }
 0x87c   : > { %v1778_v4 = vsel %vm3194_vm7, %v1773_v46, %v2469_v3  ;;  %v1779_v5 = vsel %vm3195_vm4, %v2469_v3, %v2470_v62  ;;  %v1758_v6 = vsel %vm3196_vm3, %v1753_v45, %v2464_v24  ;;  %v1759_v9 = vsel %vm3197_vm6, %v2464_v24, %v2465_v23  ;;  %2237 = vmatpush1.bf16.msk.msra.mxu0 %vm2637_vm10, %v2235_v59 }
 0x87d   : > { %v2238_v13 = vpack.c.bf16 %v1779_v5, %v1759_v9  ;;  %v2241_v14 = vpack.c.bf16 %v1778_v4, %v1758_v6  ;;  %v1797_v15 = vpop.permute.xlu1 %1796  ;;  %v1817_v16 = vpop.permute.xlu0 %1816 }
 0x87f   : > { %2240 = vmatprep.subr.msk.bf16.mxu0 %vm2661_vm13, %v2238_v13  ;;  %vm3199_vm13 = vmmov %vm3198_vm2 }
 0x880   : > { %2243 = vmatpush1.bf16.msk.msra.mxu0 %vm2669_vm14, %v2241_v14  ;;  %vm3200_vm14 = vcmask 588800  }
 0x881   : > { %v2483_v17 = vpop.permute.xlu1 %2482  ;;  %v2473_v18 = vpop.permute.xlu0 %2472 }
 0x882   : > { %v2475_v21 = vunpack.i.h.bf16 %v2473_v18  ;;  %v2474_v22 = vunpack.i.l.bf16 %v2473_v18  ;;  %v2485_v25 = vunpack.i.h.bf16 %v2483_v17  ;;  %v2484_v20 = vunpack.i.l.bf16 %v2483_v17 }
 0x884   : > { %v1802_v19 = vsel %vm506_vm15, %v1797_v15, %v2474_v22  ;;  %v1803_v26 = vsel %vm506_vm15, %v2474_v22, %v2475_v21  ;;  %v1843_v56 = vsel %vm548_vm1, %v2484_v20, %v2485_v25 }
 0x885   : > { %v2244_v27 = vpack.c.bf16 %v1803_v26, %v3056_v39  ;;  %v2247_v28 = vpack.c.bf16 %v1802_v19, %v3053_v38  ;;  %v1837_v29 = vpop.permute.xlu1 %1836  ;;  %v2478_v51 = vpop.permute.xlu0 %2477 }
 0x886   : > { %v2480_v30 = vunpack.i.h.bf16 %v2478_v51  ;;  %v2479_v34 = vunpack.i.l.bf16 %v2478_v51  ;;  %v1842_v32 = vsel %vm548_vm1, %v1837_v29, %v2484_v20 }
 0x887   : > { %2246 = vmatprep.subr.msk.bf16.mxu0 %vm2682_vm0, %v2244_v27 }
 0x888   : > { %v1822_v31 = vsel %vm3198_vm2, %v1817_v16, %v2479_v34  ;;  %v1823_v35 = vsel %vm3199_vm13, %v2479_v34, %v2480_v30  ;;  %2249 = vmatpush1.bf16.msk.msra.mxu0 %vm2691_vm5, %v2247_v28 }
 0x889   : > { %v2250_v36 = vpack.c.bf16 %v1843_v56, %v1823_v35  ;;  %v2253_v37 = vpack.c.bf16 %v1842_v32, %v1822_v31  ;;  %v1859_v38 = vpop.permute.xlu1 %1858  ;;  %v1857_v39 = vpop.permute.xlu0 %1856 }
 0x88a   : > { %v1861_v2 = vsel %vm567_vm8, %v1857_v39, %v1859_v38 }
 0x88b   : > { %2252 = vmatprep.subr.msk.bf16.mxu0 %vm2628_vm9, %v2250_v36 }
 0x88c   : > { %2255 = vmatpush1.bf16.msk.msra.mxu0 %vm2637_vm10, %v2253_v37 }
 0x88d   : > { %v1855_v43 = vpop.permute.xlu0 %1854  ;;  %2110 = vmatprep.subr.msk.mxu0 %vm2641_vm11, %v1861_v2 }
 0x88e   : > { %v1860_v63 = vsel %vm567_vm8, %v1855_v43, %v1857_v39 }
 0x890   : > { %2111 = vmatpush1.msk.msra.mxu0 %vm2645_vm12, %v1860_v63 }
 0x891   : > { %2035 = vmatmul.mubr.msk.f32.vlgmr.msra.gmra.mrb[6].mxu0 %vm3200_vm14, %v2962_v11 }
 0x964   : > { %v1952_v7 = vpop.f32.mrb[6].mxu0 }
 0x965   : > { %v1953_v33 = vadd.f32 %v1952_v7, %v2969_v12  ;;  %v1954_v1 = vpop.f32.mrb[7].mxu0 }
 0x966   : > { %v1955_v40 = vadd.f32 %v1954_v1, %v2969_v12 }
 0x967   : > { %v1957_v44 = vmax.f32 %v1953_v33, 0.0 }
 0x968   : > { %v1958_v41 = vmax.f32 %v1955_v40, 0.0 }
 0x969   : > { %v1959_v45 = vadd.f32 %v1957_v44, %v2577_v8 }
 0x96a   : > { %v1960_v42 = vadd.f32 %v1958_v41, %v2579_v10 }
 0x96b   : > { %1961 = vst [vmem:[%s278_s9] sm:$0xff] %v1959_v45 }
 0x96c   : > { %1962 = vst [vmem:[%s278_s9 + $0x8] sm:$0xff] %v1960_v42 }
 0x96d PF: > { %s17_s24 = sadd.s32 1, %s2493_s24  }
 0x96e   : > { %p14_p4 = scmp.ge.s32.totalorder %s17_s24, 4  }
 0x970   :  { %16 = sbr.rel (!%p14_p4) target bundleno = 1 (0x1), region = 78 }

</bundles_post_ra>
